<compile_context>
chip_gen: v7x
topology: tpu7x:2x2x1
jax: 0.10.0
libtpu: 0.0.40
codegen_flags: <defaults>
</compile_context>

<pallas_src>
import jax
import jax.numpy as jnp
from jax.experimental import pallas as pl
from jax.experimental.pallas import tpu as pltpu


# ----------------------------- model dimensions (small) -----------------------------
SEQ_LEN = 16          # sequence length; must equal NUM_NODES for the fusion concat
NUM_NODES = 16
NUM_EDGES = 24
NLP_INPUT = 8         # nlp_input_size
NLP_HIDDEN = 32       # nlp_hidden_size
GCN_FEATURES = 4      # gcn_node_features
GCN_HIDDEN = 32       # gcn_hidden_channels (== NLP_HIDDEN so concat/fusion is consistent)
FUSION = 2 * NLP_HIDDEN   # fusion_size == 2*hidden so decoder GRU input matches fused vec
NLP_OUTPUT = 8        # nlp_output_size


def _vmem():
    return pl.BlockSpec(memory_space=pltpu.MemorySpace.VMEM)


# ================================ single fused kernel ================================
def fused_kernel(x_ref, a_ref, gx_ref,
                 enc_wih_ref, enc_whh_ref, enc_bih_ref, enc_bhh_ref,
                 gcn_w1_ref, gcn_w2_ref, gcn_b_ref,
                 att_wseq_ref, att_wstr_ref, att_bw_ref, att_v_ref,
                 dec_wseq_ref, dec_wstr_ref, dec_bih_ref, dec_bhh_ref,
                 fc_w_ref, fc_b_ref,
                 out_ref,
                 seq_s):
    # x_ref: [T, I] f32        a_ref: [N, N] f32 (normalized adjacency)   gx_ref: [N, F0] f32
    # enc_wih: [I, 3H] bf16  enc_whh: [H, 3H] bf16  enc_bih/enc_bhh: [1, 3H] f32 (cols r|z|n)
    # gcn_w1: [F0, C] bf16  gcn_w2: [C, C] bf16  gcn_b: [2, C] f32 (rows: b1, b2)
    # att_wseq: [H, FU] bf16  att_wstr: [C, FU] bf16  att_bw/att_v: [1, FU] f32
    # dec_wseq/dec_wstr: [H, 3H] bf16  dec_bih/dec_bhh: [1, 3H] f32
    # fc_w: [H, O] bf16  fc_b: [1, O] f32      out_ref: [1, O] f32
    # scratch: seq_s: [T, H] f32 (encoder hidden states)
    T = x_ref.shape[0]
    H = NLP_HIDDEN
    f32 = jnp.float32
    bf16 = jnp.bfloat16

    # ---------------- NLP encoder: single-layer GRU over the sequence ----------------
    # Input projection hoisted out of the recurrence: ONE [T,I]@[I,3H] bf16 matmul.
    gi = (jnp.dot(x_ref[...].astype(bf16), enc_wih_ref[...],
                  preferred_element_type=f32) + enc_bih_ref[...])              # [T, 3H] f32
    whh = enc_whh_ref[...]                                                     # [H, 3H] bf16
    bhh = enc_bhh_ref[...]                                                     # [1, 3H] f32

    # TODO(synk): pltpu.matmul_push_rhs could pin `whh` in the MXU across all 16 steps;
    # kept as jnp.dot on a loop-invariant RHS for lowering robustness at these tiny shapes.
    h = jnp.zeros((1, H), f32)
    for t in range(T):                      # T is static -> fully unrolled, static slices
        gh = jnp.dot(h.astype(bf16), whh, preferred_element_type=f32) + bhh    # [1, 3H]
        g = gi[t:t + 1, :]
        r = jax.nn.sigmoid(g[:, 0:H] + gh[:, 0:H])
        z = jax.nn.sigmoid(g[:, H:2 * H] + gh[:, H:2 * H])
        n = jnp.tanh(g[:, 2 * H:3 * H] + r * gh[:, 2 * H:3 * H])
        h = (1.0 - z) * n + z * h           # gate math & hidden state stay f32
        seq_s[pl.ds(t, 1), :] = h

    # ---------------- GCN: two dense GCNConv layers ----------------
    a_bf = a_ref[...].astype(bf16)
    ax = jnp.dot(a_bf, gx_ref[...].astype(bf16), preferred_element_type=f32)   # [N, F0]
    h1 = (jnp.dot(ax.astype(bf16), gcn_w1_ref[...],
                  preferred_element_type=f32) + gcn_b_ref[0:1, :])
    h1 = jnp.maximum(h1, 0.0)                                                  # ReLU
    ah1 = jnp.dot(a_bf, h1.astype(bf16), preferred_element_type=f32)           # [N, C]
    struct = (jnp.dot(ah1.astype(bf16), gcn_w2_ref[...],
                      preferred_element_type=f32) + gcn_b_ref[1:2, :])         # [N, C]

    # ---------------- attention fusion (split weights; no lane-offset concat) --------
    seq = seq_s[...]                                                           # [T, H] f32
    seq_bf = seq.astype(bf16)
    struct_bf = struct.astype(bf16)
    energy = jnp.tanh(
        jnp.dot(seq_bf, att_wseq_ref[...], preferred_element_type=f32)
        + jnp.dot(struct_bf, att_wstr_ref[...], preferred_element_type=f32)
        + att_bw_ref[...])                                                     # [T, FU]
    # V(energy): bias is constant along the softmax axis and cancels -> dropped.
    scores = jnp.sum(energy * att_v_ref[...], axis=-1, keepdims=True)          # [T, 1]
    scores = scores - jnp.max(scores, axis=0, keepdims=True)                   # softmax(dim=T)
    e = jnp.exp(scores)
    attn = e * pl.reciprocal(jnp.sum(e, axis=0, keepdims=True), approx=True)   # [T, 1]

    # Weighted sums (kept as VPU mul + sublane reduce: [16,H] reduce is off the critical
    # path; a dot_general contracting T would need a lane-narrow transposed LHS).
    fused_seq = jnp.sum(attn * seq, axis=0, keepdims=True)                     # [1, H]
    fused_str = jnp.sum(attn * struct, axis=0, keepdims=True)                  # [1, H]

    # ---------------- decoder GRU (single step, h0 = 0) + FC ----------------
    # h0 = 0  =>  W_hh @ h0 vanishes; only b_hh contributes on the hidden side.
    dg = (jnp.dot(fused_seq.astype(bf16), dec_wseq_ref[...], preferred_element_type=f32)
          + jnp.dot(fused_str.astype(bf16), dec_wstr_ref[...], preferred_element_type=f32)
          + dec_bih_ref[...])                                                  # [1, 3H]
    bhh_d = dec_bhh_ref[...]
    r = jax.nn.sigmoid(dg[:, 0:H] + bhh_d[:, 0:H])
    z = jax.nn.sigmoid(dg[:, H:2 * H] + bhh_d[:, H:2 * H])
    n = jnp.tanh(dg[:, 2 * H:3 * H] + r * bhh_d[:, 2 * H:3 * H])
    hd = (1.0 - z) * n                                                         # [1, H]

    out_ref[...] = (jnp.dot(hd.astype(bf16), fc_w_ref[...],
                            preferred_element_type=f32) + fc_b_ref[...])


def antibody_fused(x_seq, a_norm, graph_x, p):
    return pl.pallas_call(
        fused_kernel,
        out_shape=jax.ShapeDtypeStruct((1, NLP_OUTPUT), jnp.float32),
        in_specs=[_vmem()] * 20,
        out_specs=_vmem(),
        scratch_shapes=[
            pltpu.VMEM((SEQ_LEN, NLP_HIDDEN), jnp.float32),   # seq_embed (encoder states)
        ],
    )(x_seq, a_norm, graph_x,
      p["enc_wih"], p["enc_whh"], p["enc_bih"], p["enc_bhh"],
      p["gcn_w1"], p["gcn_w2"], p["gcn_b"],
      p["att_wseq"], p["att_wstr"], p["att_bw"], p["att_v"],
      p["dec_wih_seq"], p["dec_wih_str"], p["dec_bih"], p["dec_bhh"],
      p["fc_w"], p["fc_b"])


# =============================== parameter construction ===============================
def _uniform(key, shape, scale, dtype=jnp.float32):
    w = jax.random.uniform(key, shape, jnp.float32, minval=-scale, maxval=scale)
    return w.astype(dtype)


def init_params(key):
    ks = jax.random.split(key, 17)
    H, I, F0, C, FU, O = NLP_HIDDEN, NLP_INPUT, GCN_FEATURES, GCN_HIDDEN, FUSION, NLP_OUTPUT
    bf16 = jnp.bfloat16
    s_enc = 1.0 / jnp.sqrt(H)
    s_g1 = 1.0 / jnp.sqrt(F0)
    s_g2 = 1.0 / jnp.sqrt(C)
    s_w = 1.0 / jnp.sqrt(2 * H)
    s_v = 1.0 / jnp.sqrt(FU)
    s_fc = 1.0 / jnp.sqrt(H)
    return {
        # encoder GRU: packed gate weights (cols r|z|n), transposed to [in, 3H], bf16
        "enc_wih": _uniform(ks[0], (I, 3 * H), s_enc, bf16),
        "enc_whh": _uniform(ks[1], (H, 3 * H), s_enc, bf16),
        "enc_bih": _uniform(ks[2], (1, 3 * H), s_enc),
        "enc_bhh": _uniform(ks[3], (1, 3 * H), s_enc),
        # GCN (lin weights transposed [in, out], bf16); biases packed [2, C] f32
        "gcn_w1": _uniform(ks[4], (F0, C), s_g1, bf16),
        "gcn_w2": _uniform(ks[5], (C, C), s_g2, bf16),
        "gcn_b": jnp.concatenate(
            [_uniform(ks[6], (1, C), s_g1), _uniform(ks[7], (1, C), s_g2)], axis=0),
        # attention fusion: W split along the 2H input axis (seq half / struct half)
        "att_wseq": _uniform(ks[8], (H, FU), s_w, bf16),
        "att_wstr": _uniform(ks[9], (C, FU), s_w, bf16),
        "att_bw": _uniform(ks[10], (1, FU), s_w),
        "att_v": _uniform(ks[11], (1, FU), s_v),     # V bias dropped (softmax-invariant)
        # decoder GRU: packed gate W_ih split along the FU=2H input axis; biases packed
        "dec_wih_seq": _uniform(ks[12], (H, 3 * H), s_enc, bf16),
        "dec_wih_str": _uniform(ks[13], (C, 3 * H), s_enc, bf16),
        "dec_bih": _uniform(ks[14], (1, 3 * H), s_enc),
        "dec_bhh": _uniform(ks[15], (1, 3 * H), s_enc),
        # FC head
        "fc_w": _uniform(ks[16], (H, O), s_fc, bf16),
        "fc_b": jnp.zeros((1, O), jnp.float32),
    }


def build_normalized_adjacency(edge_index, num_nodes):
    # TODO(synk): PyG GCNConv's sparse scatter message passing has no clean tiny-scale
    # Pallas equivalent; realised as dense add-self-loops + D^-1/2 A D^-1/2 in plain JAX,
    # precomputed once outside the per-call kernel path.
    src = edge_index[0]
    dst = edge_index[1]
    a = jnp.zeros((num_nodes, num_nodes), jnp.float32)
    a = a.at[dst, src].add(1.0)                 # A[j, i] = multiplicity of edge i -> j
    a = a + jnp.eye(num_nodes, dtype=jnp.float32)
    deg = jnp.sum(a, axis=1)
    dinv = jnp.where(deg > 0, 1.0 / jnp.sqrt(deg), 0.0)
    return dinv[:, None] * a * dinv[None, :]


# ==================================== full forward ====================================
@jax.jit
def antibody_forward(seq_input, a_norm, graph_input, params):
    # seq_input: [1, T, I]   a_norm: [N, N]   graph_input: [N, F0]
    out = antibody_fused(seq_input[0], a_norm, graph_input, params)   # [1, O]
    return out[None, :, :]                                            # [1, 1, O]


if __name__ == "__main__":
    key = jax.random.PRNGKey(0)
    k_seq, k_graph, k_edge, k_param = jax.random.split(key, 4)

    seq_input = jax.random.normal(k_seq, (1, SEQ_LEN, NLP_INPUT), jnp.float32)
    graph_input = jax.random.normal(k_graph, (NUM_NODES, GCN_FEATURES), jnp.float32)
    edge_index = jax.random.randint(k_edge, (2, NUM_EDGES), 0, NUM_NODES, jnp.int32)
    params = init_params(k_param)

    # Adjacency precomputed once (graph topology is fixed per molecule).
    a_norm = jax.block_until_ready(build_normalized_adjacency(edge_index, NUM_NODES))

    out = antibody_forward(seq_input, a_norm, graph_input, params)
    out = jax.block_until_ready(out)
    assert out.shape == (1, 1, NLP_OUTPUT)
    print("KERNEL_OK")
</pallas_src>

<mosaic_0001>
module attributes {stable_mosaic.version = 11 : i64} {
  func.func @fused_kernel(%arg0: memref<16x8xf32, #tpu.memory_space<vmem>>, %arg1: memref<16x16xf32, #tpu.memory_space<vmem>>, %arg2: memref<16x4xf32, #tpu.memory_space<vmem>>, %arg3: memref<8x96xbf16, #tpu.memory_space<vmem>>, %arg4: memref<32x96xbf16, #tpu.memory_space<vmem>>, %arg5: memref<1x96xf32, #tpu.memory_space<vmem>>, %arg6: memref<1x96xf32, #tpu.memory_space<vmem>>, %arg7: memref<4x32xbf16, #tpu.memory_space<vmem>>, %arg8: memref<32x32xbf16, #tpu.memory_space<vmem>>, %arg9: memref<2x32xf32, #tpu.memory_space<vmem>>, %arg10: memref<32x64xbf16, #tpu.memory_space<vmem>>, %arg11: memref<32x64xbf16, #tpu.memory_space<vmem>>, %arg12: memref<1x64xf32, #tpu.memory_space<vmem>>, %arg13: memref<1x64xf32, #tpu.memory_space<vmem>>, %arg14: memref<32x96xbf16, #tpu.memory_space<vmem>>, %arg15: memref<32x96xbf16, #tpu.memory_space<vmem>>, %arg16: memref<1x96xf32, #tpu.memory_space<vmem>>, %arg17: memref<1x96xf32, #tpu.memory_space<vmem>>, %arg18: memref<32x8xbf16, #tpu.memory_space<vmem>>, %arg19: memref<1x8xf32, #tpu.memory_space<vmem>>, %arg20: memref<1x8xf32, #tpu.memory_space<vmem>>, %arg21: memref<16x32xf32, #tpu.memory_space<vmem>>) attributes {dimension_semantics = [], scalar_prefetch = 0 : i64, scratch_operands = 1 : i64, tpu.core_type = #tpu.core_type<tc>} {
    %c0 = arith.constant 0 : index
    %c0_0 = arith.constant 0 : index
    %0 = vector.load %arg0[%c0, %c0_0] : memref<16x8xf32, #tpu.memory_space<vmem>>, vector<16x8xf32>
    %1 = arith.truncf %0 : vector<16x8xf32> to vector<16x8xbf16>
    %c0_1 = arith.constant 0 : index
    %c0_2 = arith.constant 0 : index
    %2 = vector.load %arg3[%c0_1, %c0_2] : memref<8x96xbf16, #tpu.memory_space<vmem>>, vector<8x96xbf16>
    %cst = arith.constant dense<0.000000e+00> : vector<16x96xf32>
    %3 = tpu.matmul %1, %2, %cst {dimension_numbers = #tpu.dot_dimension_numbers<[1], [0], [0], [1], [0, 0, 1, 1], [], []>} : vector<16x8xbf16>, vector<8x96xbf16>, vector<16x96xf32> -> vector<16x96xf32>
    %c0_3 = arith.constant 0 : index
    %c0_4 = arith.constant 0 : index
    %4 = vector.load %arg5[%c0_3, %c0_4] : memref<1x96xf32, #tpu.memory_space<vmem>>, vector<1x96xf32>
    %5 = vector.broadcast %4 : vector<1x96xf32> to vector<16x96xf32>
    %6 = arith.addf %3, %5 : vector<16x96xf32>
    %c0_5 = arith.constant 0 : index
    %c0_6 = arith.constant 0 : index
    %7 = vector.load %arg4[%c0_5, %c0_6] : memref<32x96xbf16, #tpu.memory_space<vmem>>, vector<32x96xbf16>
    %c0_7 = arith.constant 0 : index
    %c0_8 = arith.constant 0 : index
    %8 = vector.load %arg6[%c0_7, %c0_8] : memref<1x96xf32, #tpu.memory_space<vmem>>, vector<1x96xf32>
    %cst_9 = arith.constant 0.000000e+00 : f32
    %9 = vector.broadcast %cst_9 : f32 to vector<1x32xf32>
    %10 = arith.truncf %9 : vector<1x32xf32> to vector<1x32xbf16>
    %cst_10 = arith.constant dense<0.000000e+00> : vector<1x96xf32>
    %11 = tpu.matmul %10, %7, %cst_10 {dimension_numbers = #tpu.dot_dimension_numbers<[1], [0], [0], [1], [0, 0, 1, 1], [], []>} : vector<1x32xbf16>, vector<32x96xbf16>, vector<1x96xf32> -> vector<1x96xf32>
    %12 = arith.addf %11, %8 : vector<1x96xf32>
    %13 = vector.extract_strided_slice %6 {offsets = [0, 0], sizes = [1, 96], strides = [1, 1]} : vector<16x96xf32> to vector<1x96xf32>
    %14 = vector.extract_strided_slice %13 {offsets = [0, 0], sizes = [1, 32], strides = [1, 1]} : vector<1x96xf32> to vector<1x32xf32>
    %15 = vector.extract_strided_slice %12 {offsets = [0, 0], sizes = [1, 32], strides = [1, 1]} : vector<1x96xf32> to vector<1x32xf32>
    %16 = arith.addf %14, %15 : vector<1x32xf32>
    %17 = arith.negf %16 : vector<1x32xf32>
    %18 = math.exp %17 : vector<1x32xf32>
    %cst_11 = arith.constant 1.000000e+00 : f32
    %19 = vector.broadcast %cst_11 : f32 to vector<1x32xf32>
    %20 = arith.addf %19, %18 : vector<1x32xf32>
    %21 = arith.divf %19, %20 : vector<1x32xf32>
    %22 = vector.extract_strided_slice %13 {offsets = [0, 32], sizes = [1, 32], strides = [1, 1]} : vector<1x96xf32> to vector<1x32xf32>
    %23 = vector.extract_strided_slice %12 {offsets = [0, 32], sizes = [1, 32], strides = [1, 1]} : vector<1x96xf32> to vector<1x32xf32>
    %24 = arith.addf %22, %23 : vector<1x32xf32>
    %25 = arith.negf %24 : vector<1x32xf32>
    %26 = math.exp %25 : vector<1x32xf32>
    %cst_12 = arith.constant 1.000000e+00 : f32
    %27 = vector.broadcast %cst_12 : f32 to vector<1x32xf32>
    %28 = arith.addf %27, %26 : vector<1x32xf32>
    %29 = arith.divf %27, %28 : vector<1x32xf32>
    %30 = vector.extract_strided_slice %13 {offsets = [0, 64], sizes = [1, 32], strides = [1, 1]} : vector<1x96xf32> to vector<1x32xf32>
    %31 = vector.extract_strided_slice %12 {offsets = [0, 64], sizes = [1, 32], strides = [1, 1]} : vector<1x96xf32> to vector<1x32xf32>
    %32 = arith.mulf %21, %31 : vector<1x32xf32>
    %33 = arith.addf %30, %32 : vector<1x32xf32>
    %34 = math.tanh %33 : vector<1x32xf32>
    %cst_13 = arith.constant 1.000000e+00 : f32
    %35 = vector.broadcast %cst_13 : f32 to vector<1x32xf32>
    %36 = arith.subf %35, %29 : vector<1x32xf32>
    %37 = arith.mulf %36, %34 : vector<1x32xf32>
    %38 = arith.mulf %29, %9 : vector<1x32xf32>
    %39 = arith.addf %37, %38 : vector<1x32xf32>
    %c0_14 = arith.constant 0 : index
    %c0_15 = arith.constant 0 : index
    %40 = vector.load %arg21[%c0_14, %c0_15] : memref<16x32xf32, #tpu.memory_space<vmem>>, vector<1x32xf32>
    tpu.vector_store %arg21[%c0_14, %c0_15], %39 {strides = array<i32>} : memref<16x32xf32, #tpu.memory_space<vmem>>, vector<1x32xf32>,
    %41 = arith.truncf %39 : vector<1x32xf32> to vector<1x32xbf16>
    %cst_16 = arith.constant dense<0.000000e+00> : vector<1x96xf32>
    %42 = tpu.matmul %41, %7, %cst_16 {dimension_numbers = #tpu.dot_dimension_numbers<[1], [0], [0], [1], [0, 0, 1, 1], [], []>} : vector<1x32xbf16>, vector<32x96xbf16>, vector<1x96xf32> -> vector<1x96xf32>
    %43 = arith.addf %42, %8 : vector<1x96xf32>
    %44 = vector.extract_strided_slice %6 {offsets = [1, 0], sizes = [1, 96], strides = [1, 1]} : vector<16x96xf32> to vector<1x96xf32>
    %45 = vector.extract_strided_slice %44 {offsets = [0, 0], sizes = [1, 32], strides = [1, 1]} : vector<1x96xf32> to vector<1x32xf32>
    %46 = vector.extract_strided_slice %43 {offsets = [0, 0], sizes = [1, 32], strides = [1, 1]} : vector<1x96xf32> to vector<1x32xf32>
    %47 = arith.addf %45, %46 : vector<1x32xf32>
    %48 = arith.negf %47 : vector<1x32xf32>
    %49 = math.exp %48 : vector<1x32xf32>
    %cst_17 = arith.constant 1.000000e+00 : f32
    %50 = vector.broadcast %cst_17 : f32 to vector<1x32xf32>
    %51 = arith.addf %50, %49 : vector<1x32xf32>
    %52 = arith.divf %50, %51 : vector<1x32xf32>
    %53 = vector.extract_strided_slice %44 {offsets = [0, 32], sizes = [1, 32], strides = [1, 1]} : vector<1x96xf32> to vector<1x32xf32>
    %54 = vector.extract_strided_slice %43 {offsets = [0, 32], sizes = [1, 32], strides = [1, 1]} : vector<1x96xf32> to vector<1x32xf32>
    %55 = arith.addf %53, %54 : vector<1x32xf32>
    %56 = arith.negf %55 : vector<1x32xf32>
    %57 = math.exp %56 : vector<1x32xf32>
    %cst_18 = arith.constant 1.000000e+00 : f32
    %58 = vector.broadcast %cst_18 : f32 to vector<1x32xf32>
    %59 = arith.addf %58, %57 : vector<1x32xf32>
    %60 = arith.divf %58, %59 : vector<1x32xf32>
    %61 = vector.extract_strided_slice %44 {offsets = [0, 64], sizes = [1, 32], strides = [1, 1]} : vector<1x96xf32> to vector<1x32xf32>
    %62 = vector.extract_strided_slice %43 {offsets = [0, 64], sizes = [1, 32], strides = [1, 1]} : vector<1x96xf32> to vector<1x32xf32>
    %63 = arith.mulf %52, %62 : vector<1x32xf32>
    %64 = arith.addf %61, %63 : vector<1x32xf32>
    %65 = math.tanh %64 : vector<1x32xf32>
    %cst_19 = arith.constant 1.000000e+00 : f32
    %66 = vector.broadcast %cst_19 : f32 to vector<1x32xf32>
    %67 = arith.subf %66, %60 : vector<1x32xf32>
    %68 = arith.mulf %67, %65 : vector<1x32xf32>
    %69 = arith.mulf %60, %39 : vector<1x32xf32>
    %70 = arith.addf %68, %69 : vector<1x32xf32>
    %c1 = arith.constant 1 : index
    %c0_20 = arith.constant 0 : index
    %71 = vector.load %arg21[%c1, %c0_20] : memref<16x32xf32, #tpu.memory_space<vmem>>, vector<1x32xf32>
    tpu.vector_store %arg21[%c1, %c0_20], %70 {strides = array<i32>} : memref<16x32xf32, #tpu.memory_space<vmem>>, vector<1x32xf32>,
    %72 = arith.truncf %70 : vector<1x32xf32> to vector<1x32xbf16>
    %cst_21 = arith.constant dense<0.000000e+00> : vector<1x96xf32>
    %73 = tpu.matmul %72, %7, %cst_21 {dimension_numbers = #tpu.dot_dimension_numbers<[1], [0], [0], [1], [0, 0, 1, 1], [], []>} : vector<1x32xbf16>, vector<32x96xbf16>, vector<1x96xf32> -> vector<1x96xf32>
    %74 = arith.addf %73, %8 : vector<1x96xf32>
    %75 = vector.extract_strided_slice %6 {offsets = [2, 0], sizes = [1, 96], strides = [1, 1]} : vector<16x96xf32> to vector<1x96xf32>
    %76 = vector.extract_strided_slice %75 {offsets = [0, 0], sizes = [1, 32], strides = [1, 1]} : vector<1x96xf32> to vector<1x32xf32>
    %77 = vector.extract_strided_slice %74 {offsets = [0, 0], sizes = [1, 32], strides = [1, 1]} : vector<1x96xf32> to vector<1x32xf32>
    %78 = arith.addf %76, %77 : vector<1x32xf32>
    %79 = arith.negf %78 : vector<1x32xf32>
    %80 = math.exp %79 : vector<1x32xf32>
    %cst_22 = arith.constant 1.000000e+00 : f32
    %81 = vector.broadcast %cst_22 : f32 to vector<1x32xf32>
    %82 = arith.addf %81, %80 : vector<1x32xf32>
    %83 = arith.divf %81, %82 : vector<1x32xf32>
    %84 = vector.extract_strided_slice %75 {offsets = [0, 32], sizes = [1, 32], strides = [1, 1]} : vector<1x96xf32> to vector<1x32xf32>
    %85 = vector.extract_strided_slice %74 {offsets = [0, 32], sizes = [1, 32], strides = [1, 1]} : vector<1x96xf32> to vector<1x32xf32>
    %86 = arith.addf %84, %85 : vector<1x32xf32>
    %87 = arith.negf %86 : vector<1x32xf32>
    %88 = math.exp %87 : vector<1x32xf32>
    %cst_23 = arith.constant 1.000000e+00 : f32
    %89 = vector.broadcast %cst_23 : f32 to vector<1x32xf32>
    %90 = arith.addf %89, %88 : vector<1x32xf32>
    %91 = arith.divf %89, %90 : vector<1x32xf32>
    %92 = vector.extract_strided_slice %75 {offsets = [0, 64], sizes = [1, 32], strides = [1, 1]} : vector<1x96xf32> to vector<1x32xf32>
    %93 = vector.extract_strided_slice %74 {offsets = [0, 64], sizes = [1, 32], strides = [1, 1]} : vector<1x96xf32> to vector<1x32xf32>
    %94 = arith.mulf %83, %93 : vector<1x32xf32>
    %95 = arith.addf %92, %94 : vector<1x32xf32>
    %96 = math.tanh %95 : vector<1x32xf32>
    %cst_24 = arith.constant 1.000000e+00 : f32
    %97 = vector.broadcast %cst_24 : f32 to vector<1x32xf32>
    %98 = arith.subf %97, %91 : vector<1x32xf32>
    %99 = arith.mulf %98, %96 : vector<1x32xf32>
    %100 = arith.mulf %91, %70 : vector<1x32xf32>
    %101 = arith.addf %99, %100 : vector<1x32xf32>
    %c2 = arith.constant 2 : index
    %c0_25 = arith.constant 0 : index
    %102 = vector.load %arg21[%c2, %c0_25] : memref<16x32xf32, #tpu.memory_space<vmem>>, vector<1x32xf32>
    tpu.vector_store %arg21[%c2, %c0_25], %101 {strides = array<i32>} : memref<16x32xf32, #tpu.memory_space<vmem>>, vector<1x32xf32>,
    %103 = arith.truncf %101 : vector<1x32xf32> to vector<1x32xbf16>
    %cst_26 = arith.constant dense<0.000000e+00> : vector<1x96xf32>
    %104 = tpu.matmul %103, %7, %cst_26 {dimension_numbers = #tpu.dot_dimension_numbers<[1], [0], [0], [1], [0, 0, 1, 1], [], []>} : vector<1x32xbf16>, vector<32x96xbf16>, vector<1x96xf32> -> vector<1x96xf32>
    %105 = arith.addf %104, %8 : vector<1x96xf32>
    %106 = vector.extract_strided_slice %6 {offsets = [3, 0], sizes = [1, 96], strides = [1, 1]} : vector<16x96xf32> to vector<1x96xf32>
    %107 = vector.extract_strided_slice %106 {offsets = [0, 0], sizes = [1, 32], strides = [1, 1]} : vector<1x96xf32> to vector<1x32xf32>
    %108 = vector.extract_strided_slice %105 {offsets = [0, 0], sizes = [1, 32], strides = [1, 1]} : vector<1x96xf32> to vector<1x32xf32>
    %109 = arith.addf %107, %108 : vector<1x32xf32>
    %110 = arith.negf %109 : vector<1x32xf32>
    %111 = math.exp %110 : vector<1x32xf32>
    %cst_27 = arith.constant 1.000000e+00 : f32
    %112 = vector.broadcast %cst_27 : f32 to vector<1x32xf32>
    %113 = arith.addf %112, %111 : vector<1x32xf32>
    %114 = arith.divf %112, %113 : vector<1x32xf32>
    %115 = vector.extract_strided_slice %106 {offsets = [0, 32], sizes = [1, 32], strides = [1, 1]} : vector<1x96xf32> to vector<1x32xf32>
    %116 = vector.extract_strided_slice %105 {offsets = [0, 32], sizes = [1, 32], strides = [1, 1]} : vector<1x96xf32> to vector<1x32xf32>
    %117 = arith.addf %115, %116 : vector<1x32xf32>
    %118 = arith.negf %117 : vector<1x32xf32>
    %119 = math.exp %118 : vector<1x32xf32>
    %cst_28 = arith.constant 1.000000e+00 : f32
    %120 = vector.broadcast %cst_28 : f32 to vector<1x32xf32>
    %121 = arith.addf %120, %119 : vector<1x32xf32>
    %122 = arith.divf %120, %121 : vector<1x32xf32>
    %123 = vector.extract_strided_slice %106 {offsets = [0, 64], sizes = [1, 32], strides = [1, 1]} : vector<1x96xf32> to vector<1x32xf32>
    %124 = vector.extract_strided_slice %105 {offsets = [0, 64], sizes = [1, 32], strides = [1, 1]} : vector<1x96xf32> to vector<1x32xf32>
    %125 = arith.mulf %114, %124 : vector<1x32xf32>
    %126 = arith.addf %123, %125 : vector<1x32xf32>
    %127 = math.tanh %126 : vector<1x32xf32>
    %cst_29 = arith.constant 1.000000e+00 : f32
    %128 = vector.broadcast %cst_29 : f32 to vector<1x32xf32>
    %129 = arith.subf %128, %122 : vector<1x32xf32>
    %130 = arith.mulf %129, %127 : vector<1x32xf32>
    %131 = arith.mulf %122, %101 : vector<1x32xf32>
    %132 = arith.addf %130, %131 : vector<1x32xf32>
    %c3 = arith.constant 3 : index
    %c0_30 = arith.constant 0 : index
    %133 = vector.load %arg21[%c3, %c0_30] : memref<16x32xf32, #tpu.memory_space<vmem>>, vector<1x32xf32>
    tpu.vector_store %arg21[%c3, %c0_30], %132 {strides = array<i32>} : memref<16x32xf32, #tpu.memory_space<vmem>>, vector<1x32xf32>,
    %134 = arith.truncf %132 : vector<1x32xf32> to vector<1x32xbf16>
    %cst_31 = arith.constant dense<0.000000e+00> : vector<1x96xf32>
    %135 = tpu.matmul %134, %7, %cst_31 {dimension_numbers = #tpu.dot_dimension_numbers<[1], [0], [0], [1], [0, 0, 1, 1], [], []>} : vector<1x32xbf16>, vector<32x96xbf16>, vector<1x96xf32> -> vector<1x96xf32>
    %136 = arith.addf %135, %8 : vector<1x96xf32>
    %137 = vector.extract_strided_slice %6 {offsets = [4, 0], sizes = [1, 96], strides = [1, 1]} : vector<16x96xf32> to vector<1x96xf32>
    %138 = vector.extract_strided_slice %137 {offsets = [0, 0], sizes = [1, 32], strides = [1, 1]} : vector<1x96xf32> to vector<1x32xf32>
    %139 = vector.extract_strided_slice %136 {offsets = [0, 0], sizes = [1, 32], strides = [1, 1]} : vector<1x96xf32> to vector<1x32xf32>
    %140 = arith.addf %138, %139 : vector<1x32xf32>
    %141 = arith.negf %140 : vector<1x32xf32>
    %142 = math.exp %141 : vector<1x32xf32>
    %cst_32 = arith.constant 1.000000e+00 : f32
    %143 = vector.broadcast %cst_32 : f32 to vector<1x32xf32>
    %144 = arith.addf %143, %142 : vector<1x32xf32>
    %145 = arith.divf %143, %144 : vector<1x32xf32>
    %146 = vector.extract_strided_slice %137 {offsets = [0, 32], sizes = [1, 32], strides = [1, 1]} : vector<1x96xf32> to vector<1x32xf32>
    %147 = vector.extract_strided_slice %136 {offsets = [0, 32], sizes = [1, 32], strides = [1, 1]} : vector<1x96xf32> to vector<1x32xf32>
    %148 = arith.addf %146, %147 : vector<1x32xf32>
    %149 = arith.negf %148 : vector<1x32xf32>
    %150 = math.exp %149 : vector<1x32xf32>
    %cst_33 = arith.constant 1.000000e+00 : f32
    %151 = vector.broadcast %cst_33 : f32 to vector<1x32xf32>
    %152 = arith.addf %151, %150 : vector<1x32xf32>
    %153 = arith.divf %151, %152 : vector<1x32xf32>
    %154 = vector.extract_strided_slice %137 {offsets = [0, 64], sizes = [1, 32], strides = [1, 1]} : vector<1x96xf32> to vector<1x32xf32>
    %155 = vector.extract_strided_slice %136 {offsets = [0, 64], sizes = [1, 32], strides = [1, 1]} : vector<1x96xf32> to vector<1x32xf32>
    %156 = arith.mulf %145, %155 : vector<1x32xf32>
    %157 = arith.addf %154, %156 : vector<1x32xf32>
    %158 = math.tanh %157 : vector<1x32xf32>
    %cst_34 = arith.constant 1.000000e+00 : f32
    %159 = vector.broadcast %cst_34 : f32 to vector<1x32xf32>
    %160 = arith.subf %159, %153 : vector<1x32xf32>
    %161 = arith.mulf %160, %158 : vector<1x32xf32>
    %162 = arith.mulf %153, %132 : vector<1x32xf32>
    %163 = arith.addf %161, %162 : vector<1x32xf32>
    %c4 = arith.constant 4 : index
    %c0_35 = arith.constant 0 : index
    %164 = vector.load %arg21[%c4, %c0_35] : memref<16x32xf32, #tpu.memory_space<vmem>>, vector<1x32xf32>
    tpu.vector_store %arg21[%c4, %c0_35], %163 {strides = array<i32>} : memref<16x32xf32, #tpu.memory_space<vmem>>, vector<1x32xf32>,
    %165 = arith.truncf %163 : vector<1x32xf32> to vector<1x32xbf16>
    %cst_36 = arith.constant dense<0.000000e+00> : vector<1x96xf32>
    %166 = tpu.matmul %165, %7, %cst_36 {dimension_numbers = #tpu.dot_dimension_numbers<[1], [0], [0], [1], [0, 0, 1, 1], [], []>} : vector<1x32xbf16>, vector<32x96xbf16>, vector<1x96xf32> -> vector<1x96xf32>
    %167 = arith.addf %166, %8 : vector<1x96xf32>
    %168 = vector.extract_strided_slice %6 {offsets = [5, 0], sizes = [1, 96], strides = [1, 1]} : vector<16x96xf32> to vector<1x96xf32>
    %169 = vector.extract_strided_slice %168 {offsets = [0, 0], sizes = [1, 32], strides = [1, 1]} : vector<1x96xf32> to vector<1x32xf32>
    %170 = vector.extract_strided_slice %167 {offsets = [0, 0], sizes = [1, 32], strides = [1, 1]} : vector<1x96xf32> to vector<1x32xf32>
    %171 = arith.addf %169, %170 : vector<1x32xf32>
    %172 = arith.negf %171 : vector<1x32xf32>
    %173 = math.exp %172 : vector<1x32xf32>
    %cst_37 = arith.constant 1.000000e+00 : f32
    %174 = vector.broadcast %cst_37 : f32 to vector<1x32xf32>
    %175 = arith.addf %174, %173 : vector<1x32xf32>
    %176 = arith.divf %174, %175 : vector<1x32xf32>
    %177 = vector.extract_strided_slice %168 {offsets = [0, 32], sizes = [1, 32], strides = [1, 1]} : vector<1x96xf32> to vector<1x32xf32>
    %178 = vector.extract_strided_slice %167 {offsets = [0, 32], sizes = [1, 32], strides = [1, 1]} : vector<1x96xf32> to vector<1x32xf32>
    %179 = arith.addf %177, %178 : vector<1x32xf32>
    %180 = arith.negf %179 : vector<1x32xf32>
    %181 = math.exp %180 : vector<1x32xf32>
    %cst_38 = arith.constant 1.000000e+00 : f32
    %182 = vector.broadcast %cst_38 : f32 to vector<1x32xf32>
    %183 = arith.addf %182, %181 : vector<1x32xf32>
    %184 = arith.divf %182, %183 : vector<1x32xf32>
    %185 = vector.extract_strided_slice %168 {offsets = [0, 64], sizes = [1, 32], strides = [1, 1]} : vector<1x96xf32> to vector<1x32xf32>
    %186 = vector.extract_strided_slice %167 {offsets = [0, 64], sizes = [1, 32], strides = [1, 1]} : vector<1x96xf32> to vector<1x32xf32>
    %187 = arith.mulf %176, %186 : vector<1x32xf32>
    %188 = arith.addf %185, %187 : vector<1x32xf32>
    %189 = math.tanh %188 : vector<1x32xf32>
    %cst_39 = arith.constant 1.000000e+00 : f32
    %190 = vector.broadcast %cst_39 : f32 to vector<1x32xf32>
    %191 = arith.subf %190, %184 : vector<1x32xf32>
    %192 = arith.mulf %191, %189 : vector<1x32xf32>
    %193 = arith.mulf %184, %163 : vector<1x32xf32>
    %194 = arith.addf %192, %193 : vector<1x32xf32>
    %c5 = arith.constant 5 : index
    %c0_40 = arith.constant 0 : index
    %195 = vector.load %arg21[%c5, %c0_40] : memref<16x32xf32, #tpu.memory_space<vmem>>, vector<1x32xf32>
    tpu.vector_store %arg21[%c5, %c0_40], %194 {strides = array<i32>} : memref<16x32xf32, #tpu.memory_space<vmem>>, vector<1x32xf32>,
    %196 = arith.truncf %194 : vector<1x32xf32> to vector<1x32xbf16>
    %cst_41 = arith.constant dense<0.000000e+00> : vector<1x96xf32>
    %197 = tpu.matmul %196, %7, %cst_41 {dimension_numbers = #tpu.dot_dimension_numbers<[1], [0], [0], [1], [0, 0, 1, 1], [], []>} : vector<1x32xbf16>, vector<32x96xbf16>, vector<1x96xf32> -> vector<1x96xf32>
    %198 = arith.addf %197, %8 : vector<1x96xf32>
    %199 = vector.extract_strided_slice %6 {offsets = [6, 0], sizes = [1, 96], strides = [1, 1]} : vector<16x96xf32> to vector<1x96xf32>
    %200 = vector.extract_strided_slice %199 {offsets = [0, 0], sizes = [1, 32], strides = [1, 1]} : vector<1x96xf32> to vector<1x32xf32>
    %201 = vector.extract_strided_slice %198 {offsets = [0, 0], sizes = [1, 32], strides = [1, 1]} : vector<1x96xf32> to vector<1x32xf32>
    %202 = arith.addf %200, %201 : vector<1x32xf32>
    %203 = arith.negf %202 : vector<1x32xf32>
    %204 = math.exp %203 : vector<1x32xf32>
    %cst_42 = arith.constant 1.000000e+00 : f32
    %205 = vector.broadcast %cst_42 : f32 to vector<1x32xf32>
    %206 = arith.addf %205, %204 : vector<1x32xf32>
    %207 = arith.divf %205, %206 : vector<1x32xf32>
    %208 = vector.extract_strided_slice %199 {offsets = [0, 32], sizes = [1, 32], strides = [1, 1]} : vector<1x96xf32> to vector<1x32xf32>
    %209 = vector.extract_strided_slice %198 {offsets = [0, 32], sizes = [1, 32], strides = [1, 1]} : vector<1x96xf32> to vector<1x32xf32>
    %210 = arith.addf %208, %209 : vector<1x32xf32>
    %211 = arith.negf %210 : vector<1x32xf32>
    %212 = math.exp %211 : vector<1x32xf32>
    %cst_43 = arith.constant 1.000000e+00 : f32
    %213 = vector.broadcast %cst_43 : f32 to vector<1x32xf32>
    %214 = arith.addf %213, %212 : vector<1x32xf32>
    %215 = arith.divf %213, %214 : vector<1x32xf32>
    %216 = vector.extract_strided_slice %199 {offsets = [0, 64], sizes = [1, 32], strides = [1, 1]} : vector<1x96xf32> to vector<1x32xf32>
    %217 = vector.extract_strided_slice %198 {offsets = [0, 64], sizes = [1, 32], strides = [1, 1]} : vector<1x96xf32> to vector<1x32xf32>
    %218 = arith.mulf %207, %217 : vector<1x32xf32>
    %219 = arith.addf %216, %218 : vector<1x32xf32>
    %220 = math.tanh %219 : vector<1x32xf32>
    %cst_44 = arith.constant 1.000000e+00 : f32
    %221 = vector.broadcast %cst_44 : f32 to vector<1x32xf32>
    %222 = arith.subf %221, %215 : vector<1x32xf32>
    %223 = arith.mulf %222, %220 : vector<1x32xf32>
    %224 = arith.mulf %215, %194 : vector<1x32xf32>
    %225 = arith.addf %223, %224 : vector<1x32xf32>
    %c6 = arith.constant 6 : index
    %c0_45 = arith.constant 0 : index
    %226 = vector.load %arg21[%c6, %c0_45] : memref<16x32xf32, #tpu.memory_space<vmem>>, vector<1x32xf32>
    tpu.vector_store %arg21[%c6, %c0_45], %225 {strides = array<i32>} : memref<16x32xf32, #tpu.memory_space<vmem>>, vector<1x32xf32>,
    %227 = arith.truncf %225 : vector<1x32xf32> to vector<1x32xbf16>
    %cst_46 = arith.constant dense<0.000000e+00> : vector<1x96xf32>
    %228 = tpu.matmul %227, %7, %cst_46 {dimension_numbers = #tpu.dot_dimension_numbers<[1], [0], [0], [1], [0, 0, 1, 1], [], []>} : vector<1x32xbf16>, vector<32x96xbf16>, vector<1x96xf32> -> vector<1x96xf32>
    %229 = arith.addf %228, %8 : vector<1x96xf32>
    %230 = vector.extract_strided_slice %6 {offsets = [7, 0], sizes = [1, 96], strides = [1, 1]} : vector<16x96xf32> to vector<1x96xf32>
    %231 = vector.extract_strided_slice %230 {offsets = [0, 0], sizes = [1, 32], strides = [1, 1]} : vector<1x96xf32> to vector<1x32xf32>
    %232 = vector.extract_strided_slice %229 {offsets = [0, 0], sizes = [1, 32], strides = [1, 1]} : vector<1x96xf32> to vector<1x32xf32>
    %233 = arith.addf %231, %232 : vector<1x32xf32>
    %234 = arith.negf %233 : vector<1x32xf32>
    %235 = math.exp %234 : vector<1x32xf32>
    %cst_47 = arith.constant 1.000000e+00 : f32
    %236 = vector.broadcast %cst_47 : f32 to vector<1x32xf32>
    %237 = arith.addf %236, %235 : vector<1x32xf32>
    %238 = arith.divf %236, %237 : vector<1x32xf32>
    %239 = vector.extract_strided_slice %230 {offsets = [0, 32], sizes = [1, 32], strides = [1, 1]} : vector<1x96xf32> to vector<1x32xf32>
    %240 = vector.extract_strided_slice %229 {offsets = [0, 32], sizes = [1, 32], strides = [1, 1]} : vector<1x96xf32> to vector<1x32xf32>
    %241 = arith.addf %239, %240 : vector<1x32xf32>
    %242 = arith.negf %241 : vector<1x32xf32>
    %243 = math.exp %242 : vector<1x32xf32>
    %cst_48 = arith.constant 1.000000e+00 : f32
    %244 = vector.broadcast %cst_48 : f32 to vector<1x32xf32>
    %245 = arith.addf %244, %243 : vector<1x32xf32>
    %246 = arith.divf %244, %245 : vector<1x32xf32>
    %247 = vector.extract_strided_slice %230 {offsets = [0, 64], sizes = [1, 32], strides = [1, 1]} : vector<1x96xf32> to vector<1x32xf32>
    %248 = vector.extract_strided_slice %229 {offsets = [0, 64], sizes = [1, 32], strides = [1, 1]} : vector<1x96xf32> to vector<1x32xf32>
    %249 = arith.mulf %238, %248 : vector<1x32xf32>
    %250 = arith.addf %247, %249 : vector<1x32xf32>
    %251 = math.tanh %250 : vector<1x32xf32>
    %cst_49 = arith.constant 1.000000e+00 : f32
    %252 = vector.broadcast %cst_49 : f32 to vector<1x32xf32>
    %253 = arith.subf %252, %246 : vector<1x32xf32>
    %254 = arith.mulf %253, %251 : vector<1x32xf32>
    %255 = arith.mulf %246, %225 : vector<1x32xf32>
    %256 = arith.addf %254, %255 : vector<1x32xf32>
    %c7 = arith.constant 7 : index
    %c0_50 = arith.constant 0 : index
    %257 = vector.load %arg21[%c7, %c0_50] : memref<16x32xf32, #tpu.memory_space<vmem>>, vector<1x32xf32>
    tpu.vector_store %arg21[%c7, %c0_50], %256 {strides = array<i32>} : memref<16x32xf32, #tpu.memory_space<vmem>>, vector<1x32xf32>,
    %258 = arith.truncf %256 : vector<1x32xf32> to vector<1x32xbf16>
    %cst_51 = arith.constant dense<0.000000e+00> : vector<1x96xf32>
    %259 = tpu.matmul %258, %7, %cst_51 {dimension_numbers = #tpu.dot_dimension_numbers<[1], [0], [0], [1], [0, 0, 1, 1], [], []>} : vector<1x32xbf16>, vector<32x96xbf16>, vector<1x96xf32> -> vector<1x96xf32>
    %260 = arith.addf %259, %8 : vector<1x96xf32>
    %261 = vector.extract_strided_slice %6 {offsets = [8, 0], sizes = [1, 96], strides = [1, 1]} : vector<16x96xf32> to vector<1x96xf32>
    %262 = vector.extract_strided_slice %261 {offsets = [0, 0], sizes = [1, 32], strides = [1, 1]} : vector<1x96xf32> to vector<1x32xf32>
    %263 = vector.extract_strided_slice %260 {offsets = [0, 0], sizes = [1, 32], strides = [1, 1]} : vector<1x96xf32> to vector<1x32xf32>
    %264 = arith.addf %262, %263 : vector<1x32xf32>
    %265 = arith.negf %264 : vector<1x32xf32>
    %266 = math.exp %265 : vector<1x32xf32>
    %cst_52 = arith.constant 1.000000e+00 : f32
    %267 = vector.broadcast %cst_52 : f32 to vector<1x32xf32>
    %268 = arith.addf %267, %266 : vector<1x32xf32>
    %269 = arith.divf %267, %268 : vector<1x32xf32>
    %270 = vector.extract_strided_slice %261 {offsets = [0, 32], sizes = [1, 32], strides = [1, 1]} : vector<1x96xf32> to vector<1x32xf32>
    %271 = vector.extract_strided_slice %260 {offsets = [0, 32], sizes = [1, 32], strides = [1, 1]} : vector<1x96xf32> to vector<1x32xf32>
    %272 = arith.addf %270, %271 : vector<1x32xf32>
    %273 = arith.negf %272 : vector<1x32xf32>
    %274 = math.exp %273 : vector<1x32xf32>
    %cst_53 = arith.constant 1.000000e+00 : f32
    %275 = vector.broadcast %cst_53 : f32 to vector<1x32xf32>
    %276 = arith.addf %275, %274 : vector<1x32xf32>
    %277 = arith.divf %275, %276 : vector<1x32xf32>
    %278 = vector.extract_strided_slice %261 {offsets = [0, 64], sizes = [1, 32], strides = [1, 1]} : vector<1x96xf32> to vector<1x32xf32>
    %279 = vector.extract_strided_slice %260 {offsets = [0, 64], sizes = [1, 32], strides = [1, 1]} : vector<1x96xf32> to vector<1x32xf32>
    %280 = arith.mulf %269, %279 : vector<1x32xf32>
    %281 = arith.addf %278, %280 : vector<1x32xf32>
    %282 = math.tanh %281 : vector<1x32xf32>
    %cst_54 = arith.constant 1.000000e+00 : f32
    %283 = vector.broadcast %cst_54 : f32 to vector<1x32xf32>
    %284 = arith.subf %283, %277 : vector<1x32xf32>
    %285 = arith.mulf %284, %282 : vector<1x32xf32>
    %286 = arith.mulf %277, %256 : vector<1x32xf32>
    %287 = arith.addf %285, %286 : vector<1x32xf32>
    %c8 = arith.constant 8 : index
    %c0_55 = arith.constant 0 : index
    %288 = vector.load %arg21[%c8, %c0_55] : memref<16x32xf32, #tpu.memory_space<vmem>>, vector<1x32xf32>
    tpu.vector_store %arg21[%c8, %c0_55], %287 {strides = array<i32>} : memref<16x32xf32, #tpu.memory_space<vmem>>, vector<1x32xf32>,
    %289 = arith.truncf %287 : vector<1x32xf32> to vector<1x32xbf16>
    %cst_56 = arith.constant dense<0.000000e+00> : vector<1x96xf32>
    %290 = tpu.matmul %289, %7, %cst_56 {dimension_numbers = #tpu.dot_dimension_numbers<[1], [0], [0], [1], [0, 0, 1, 1], [], []>} : vector<1x32xbf16>, vector<32x96xbf16>, vector<1x96xf32> -> vector<1x96xf32>
    %291 = arith.addf %290, %8 : vector<1x96xf32>
    %292 = vector.extract_strided_slice %6 {offsets = [9, 0], sizes = [1, 96], strides = [1, 1]} : vector<16x96xf32> to vector<1x96xf32>
    %293 = vector.extract_strided_slice %292 {offsets = [0, 0], sizes = [1, 32], strides = [1, 1]} : vector<1x96xf32> to vector<1x32xf32>
    %294 = vector.extract_strided_slice %291 {offsets = [0, 0], sizes = [1, 32], strides = [1, 1]} : vector<1x96xf32> to vector<1x32xf32>
    %295 = arith.addf %293, %294 : vector<1x32xf32>
    %296 = arith.negf %295 : vector<1x32xf32>
    %297 = math.exp %296 : vector<1x32xf32>
    %cst_57 = arith.constant 1.000000e+00 : f32
    %298 = vector.broadcast %cst_57 : f32 to vector<1x32xf32>
    %299 = arith.addf %298, %297 : vector<1x32xf32>
    %300 = arith.divf %298, %299 : vector<1x32xf32>
    %301 = vector.extract_strided_slice %292 {offsets = [0, 32], sizes = [1, 32], strides = [1, 1]} : vector<1x96xf32> to vector<1x32xf32>
    %302 = vector.extract_strided_slice %291 {offsets = [0, 32], sizes = [1, 32], strides = [1, 1]} : vector<1x96xf32> to vector<1x32xf32>
    %303 = arith.addf %301, %302 : vector<1x32xf32>
    %304 = arith.negf %303 : vector<1x32xf32>
    %305 = math.exp %304 : vector<1x32xf32>
    %cst_58 = arith.constant 1.000000e+00 : f32
    %306 = vector.broadcast %cst_58 : f32 to vector<1x32xf32>
    %307 = arith.addf %306, %305 : vector<1x32xf32>
    %308 = arith.divf %306, %307 : vector<1x32xf32>
    %309 = vector.extract_strided_slice %292 {offsets = [0, 64], sizes = [1, 32], strides = [1, 1]} : vector<1x96xf32> to vector<1x32xf32>
    %310 = vector.extract_strided_slice %291 {offsets = [0, 64], sizes = [1, 32], strides = [1, 1]} : vector<1x96xf32> to vector<1x32xf32>
    %311 = arith.mulf %300, %310 : vector<1x32xf32>
    %312 = arith.addf %309, %311 : vector<1x32xf32>
    %313 = math.tanh %312 : vector<1x32xf32>
    %cst_59 = arith.constant 1.000000e+00 : f32
    %314 = vector.broadcast %cst_59 : f32 to vector<1x32xf32>
    %315 = arith.subf %314, %308 : vector<1x32xf32>
    %316 = arith.mulf %315, %313 : vector<1x32xf32>
    %317 = arith.mulf %308, %287 : vector<1x32xf32>
    %318 = arith.addf %316, %317 : vector<1x32xf32>
    %c9 = arith.constant 9 : index
    %c0_60 = arith.constant 0 : index
    %319 = vector.load %arg21[%c9, %c0_60] : memref<16x32xf32, #tpu.memory_space<vmem>>, vector<1x32xf32>
    tpu.vector_store %arg21[%c9, %c0_60], %318 {strides = array<i32>} : memref<16x32xf32, #tpu.memory_space<vmem>>, vector<1x32xf32>,
    %320 = arith.truncf %318 : vector<1x32xf32> to vector<1x32xbf16>
    %cst_61 = arith.constant dense<0.000000e+00> : vector<1x96xf32>
    %321 = tpu.matmul %320, %7, %cst_61 {dimension_numbers = #tpu.dot_dimension_numbers<[1], [0], [0], [1], [0, 0, 1, 1], [], []>} : vector<1x32xbf16>, vector<32x96xbf16>, vector<1x96xf32> -> vector<1x96xf32>
    %322 = arith.addf %321, %8 : vector<1x96xf32>
    %323 = vector.extract_strided_slice %6 {offsets = [10, 0], sizes = [1, 96], strides = [1, 1]} : vector<16x96xf32> to vector<1x96xf32>
    %324 = vector.extract_strided_slice %323 {offsets = [0, 0], sizes = [1, 32], strides = [1, 1]} : vector<1x96xf32> to vector<1x32xf32>
    %325 = vector.extract_strided_slice %322 {offsets = [0, 0], sizes = [1, 32], strides = [1, 1]} : vector<1x96xf32> to vector<1x32xf32>
    %326 = arith.addf %324, %325 : vector<1x32xf32>
    %327 = arith.negf %326 : vector<1x32xf32>
    %328 = math.exp %327 : vector<1x32xf32>
    %cst_62 = arith.constant 1.000000e+00 : f32
    %329 = vector.broadcast %cst_62 : f32 to vector<1x32xf32>
    %330 = arith.addf %329, %328 : vector<1x32xf32>
    %331 = arith.divf %329, %330 : vector<1x32xf32>
    %332 = vector.extract_strided_slice %323 {offsets = [0, 32], sizes = [1, 32], strides = [1, 1]} : vector<1x96xf32> to vector<1x32xf32>
    %333 = vector.extract_strided_slice %322 {offsets = [0, 32], sizes = [1, 32], strides = [1, 1]} : vector<1x96xf32> to vector<1x32xf32>
    %334 = arith.addf %332, %333 : vector<1x32xf32>
    %335 = arith.negf %334 : vector<1x32xf32>
    %336 = math.exp %335 : vector<1x32xf32>
    %cst_63 = arith.constant 1.000000e+00 : f32
    %337 = vector.broadcast %cst_63 : f32 to vector<1x32xf32>
    %338 = arith.addf %337, %336 : vector<1x32xf32>
    %339 = arith.divf %337, %338 : vector<1x32xf32>
    %340 = vector.extract_strided_slice %323 {offsets = [0, 64], sizes = [1, 32], strides = [1, 1]} : vector<1x96xf32> to vector<1x32xf32>
    %341 = vector.extract_strided_slice %322 {offsets = [0, 64], sizes = [1, 32], strides = [1, 1]} : vector<1x96xf32> to vector<1x32xf32>
    %342 = arith.mulf %331, %341 : vector<1x32xf32>
    %343 = arith.addf %340, %342 : vector<1x32xf32>
    %344 = math.tanh %343 : vector<1x32xf32>
    %cst_64 = arith.constant 1.000000e+00 : f32
    %345 = vector.broadcast %cst_64 : f32 to vector<1x32xf32>
    %346 = arith.subf %345, %339 : vector<1x32xf32>
    %347 = arith.mulf %346, %344 : vector<1x32xf32>
    %348 = arith.mulf %339, %318 : vector<1x32xf32>
    %349 = arith.addf %347, %348 : vector<1x32xf32>
    %c10 = arith.constant 10 : index
    %c0_65 = arith.constant 0 : index
    %350 = vector.load %arg21[%c10, %c0_65] : memref<16x32xf32, #tpu.memory_space<vmem>>, vector<1x32xf32>
    tpu.vector_store %arg21[%c10, %c0_65], %349 {strides = array<i32>} : memref<16x32xf32, #tpu.memory_space<vmem>>, vector<1x32xf32>,
    %351 = arith.truncf %349 : vector<1x32xf32> to vector<1x32xbf16>
    %cst_66 = arith.constant dense<0.000000e+00> : vector<1x96xf32>
    %352 = tpu.matmul %351, %7, %cst_66 {dimension_numbers = #tpu.dot_dimension_numbers<[1], [0], [0], [1], [0, 0, 1, 1], [], []>} : vector<1x32xbf16>, vector<32x96xbf16>, vector<1x96xf32> -> vector<1x96xf32>
    %353 = arith.addf %352, %8 : vector<1x96xf32>
    %354 = vector.extract_strided_slice %6 {offsets = [11, 0], sizes = [1, 96], strides = [1, 1]} : vector<16x96xf32> to vector<1x96xf32>
    %355 = vector.extract_strided_slice %354 {offsets = [0, 0], sizes = [1, 32], strides = [1, 1]} : vector<1x96xf32> to vector<1x32xf32>
    %356 = vector.extract_strided_slice %353 {offsets = [0, 0], sizes = [1, 32], strides = [1, 1]} : vector<1x96xf32> to vector<1x32xf32>
    %357 = arith.addf %355, %356 : vector<1x32xf32>
    %358 = arith.negf %357 : vector<1x32xf32>
    %359 = math.exp %358 : vector<1x32xf32>
    %cst_67 = arith.constant 1.000000e+00 : f32
    %360 = vector.broadcast %cst_67 : f32 to vector<1x32xf32>
    %361 = arith.addf %360, %359 : vector<1x32xf32>
    %362 = arith.divf %360, %361 : vector<1x32xf32>
    %363 = vector.extract_strided_slice %354 {offsets = [0, 32], sizes = [1, 32], strides = [1, 1]} : vector<1x96xf32> to vector<1x32xf32>
    %364 = vector.extract_strided_slice %353 {offsets = [0, 32], sizes = [1, 32], strides = [1, 1]} : vector<1x96xf32> to vector<1x32xf32>
    %365 = arith.addf %363, %364 : vector<1x32xf32>
    %366 = arith.negf %365 : vector<1x32xf32>
    %367 = math.exp %366 : vector<1x32xf32>
    %cst_68 = arith.constant 1.000000e+00 : f32
    %368 = vector.broadcast %cst_68 : f32 to vector<1x32xf32>
    %369 = arith.addf %368, %367 : vector<1x32xf32>
    %370 = arith.divf %368, %369 : vector<1x32xf32>
    %371 = vector.extract_strided_slice %354 {offsets = [0, 64], sizes = [1, 32], strides = [1, 1]} : vector<1x96xf32> to vector<1x32xf32>
    %372 = vector.extract_strided_slice %353 {offsets = [0, 64], sizes = [1, 32], strides = [1, 1]} : vector<1x96xf32> to vector<1x32xf32>
    %373 = arith.mulf %362, %372 : vector<1x32xf32>
    %374 = arith.addf %371, %373 : vector<1x32xf32>
    %375 = math.tanh %374 : vector<1x32xf32>
    %cst_69 = arith.constant 1.000000e+00 : f32
    %376 = vector.broadcast %cst_69 : f32 to vector<1x32xf32>
    %377 = arith.subf %376, %370 : vector<1x32xf32>
    %378 = arith.mulf %377, %375 : vector<1x32xf32>
    %379 = arith.mulf %370, %349 : vector<1x32xf32>
    %380 = arith.addf %378, %379 : vector<1x32xf32>
    %c11 = arith.constant 11 : index
    %c0_70 = arith.constant 0 : index
    %381 = vector.load %arg21[%c11, %c0_70] : memref<16x32xf32, #tpu.memory_space<vmem>>, vector<1x32xf32>
    tpu.vector_store %arg21[%c11, %c0_70], %380 {strides = array<i32>} : memref<16x32xf32, #tpu.memory_space<vmem>>, vector<1x32xf32>,
    %382 = arith.truncf %380 : vector<1x32xf32> to vector<1x32xbf16>
    %cst_71 = arith.constant dense<0.000000e+00> : vector<1x96xf32>
    %383 = tpu.matmul %382, %7, %cst_71 {dimension_numbers = #tpu.dot_dimension_numbers<[1], [0], [0], [1], [0, 0, 1, 1], [], []>} : vector<1x32xbf16>, vector<32x96xbf16>, vector<1x96xf32> -> vector<1x96xf32>
    %384 = arith.addf %383, %8 : vector<1x96xf32>
    %385 = vector.extract_strided_slice %6 {offsets = [12, 0], sizes = [1, 96], strides = [1, 1]} : vector<16x96xf32> to vector<1x96xf32>
    %386 = vector.extract_strided_slice %385 {offsets = [0, 0], sizes = [1, 32], strides = [1, 1]} : vector<1x96xf32> to vector<1x32xf32>
    %387 = vector.extract_strided_slice %384 {offsets = [0, 0], sizes = [1, 32], strides = [1, 1]} : vector<1x96xf32> to vector<1x32xf32>
    %388 = arith.addf %386, %387 : vector<1x32xf32>
    %389 = arith.negf %388 : vector<1x32xf32>
    %390 = math.exp %389 : vector<1x32xf32>
    %cst_72 = arith.constant 1.000000e+00 : f32
    %391 = vector.broadcast %cst_72 : f32 to vector<1x32xf32>
    %392 = arith.addf %391, %390 : vector<1x32xf32>
    %393 = arith.divf %391, %392 : vector<1x32xf32>
    %394 = vector.extract_strided_slice %385 {offsets = [0, 32], sizes = [1, 32], strides = [1, 1]} : vector<1x96xf32> to vector<1x32xf32>
    %395 = vector.extract_strided_slice %384 {offsets = [0, 32], sizes = [1, 32], strides = [1, 1]} : vector<1x96xf32> to vector<1x32xf32>
    %396 = arith.addf %394, %395 : vector<1x32xf32>
    %397 = arith.negf %396 : vector<1x32xf32>
    %398 = math.exp %397 : vector<1x32xf32>
    %cst_73 = arith.constant 1.000000e+00 : f32
    %399 = vector.broadcast %cst_73 : f32 to vector<1x32xf32>
    %400 = arith.addf %399, %398 : vector<1x32xf32>
    %401 = arith.divf %399, %400 : vector<1x32xf32>
    %402 = vector.extract_strided_slice %385 {offsets = [0, 64], sizes = [1, 32], strides = [1, 1]} : vector<1x96xf32> to vector<1x32xf32>
    %403 = vector.extract_strided_slice %384 {offsets = [0, 64], sizes = [1, 32], strides = [1, 1]} : vector<1x96xf32> to vector<1x32xf32>
    %404 = arith.mulf %393, %403 : vector<1x32xf32>
    %405 = arith.addf %402, %404 : vector<1x32xf32>
    %406 = math.tanh %405 : vector<1x32xf32>
    %cst_74 = arith.constant 1.000000e+00 : f32
    %407 = vector.broadcast %cst_74 : f32 to vector<1x32xf32>
    %408 = arith.subf %407, %401 : vector<1x32xf32>
    %409 = arith.mulf %408, %406 : vector<1x32xf32>
    %410 = arith.mulf %401, %380 : vector<1x32xf32>
    %411 = arith.addf %409, %410 : vector<1x32xf32>
    %c12 = arith.constant 12 : index
    %c0_75 = arith.constant 0 : index
    %412 = vector.load %arg21[%c12, %c0_75] : memref<16x32xf32, #tpu.memory_space<vmem>>, vector<1x32xf32>
    tpu.vector_store %arg21[%c12, %c0_75], %411 {strides = array<i32>} : memref<16x32xf32, #tpu.memory_space<vmem>>, vector<1x32xf32>,
    %413 = arith.truncf %411 : vector<1x32xf32> to vector<1x32xbf16>
    %cst_76 = arith.constant dense<0.000000e+00> : vector<1x96xf32>
    %414 = tpu.matmul %413, %7, %cst_76 {dimension_numbers = #tpu.dot_dimension_numbers<[1], [0], [0], [1], [0, 0, 1, 1], [], []>} : vector<1x32xbf16>, vector<32x96xbf16>, vector<1x96xf32> -> vector<1x96xf32>
    %415 = arith.addf %414, %8 : vector<1x96xf32>
    %416 = vector.extract_strided_slice %6 {offsets = [13, 0], sizes = [1, 96], strides = [1, 1]} : vector<16x96xf32> to vector<1x96xf32>
    %417 = vector.extract_strided_slice %416 {offsets = [0, 0], sizes = [1, 32], strides = [1, 1]} : vector<1x96xf32> to vector<1x32xf32>
    %418 = vector.extract_strided_slice %415 {offsets = [0, 0], sizes = [1, 32], strides = [1, 1]} : vector<1x96xf32> to vector<1x32xf32>
    %419 = arith.addf %417, %418 : vector<1x32xf32>
    %420 = arith.negf %419 : vector<1x32xf32>
    %421 = math.exp %420 : vector<1x32xf32>
    %cst_77 = arith.constant 1.000000e+00 : f32
    %422 = vector.broadcast %cst_77 : f32 to vector<1x32xf32>
    %423 = arith.addf %422, %421 : vector<1x32xf32>
    %424 = arith.divf %422, %423 : vector<1x32xf32>
    %425 = vector.extract_strided_slice %416 {offsets = [0, 32], sizes = [1, 32], strides = [1, 1]} : vector<1x96xf32> to vector<1x32xf32>
    %426 = vector.extract_strided_slice %415 {offsets = [0, 32], sizes = [1, 32], strides = [1, 1]} : vector<1x96xf32> to vector<1x32xf32>
    %427 = arith.addf %425, %426 : vector<1x32xf32>
    %428 = arith.negf %427 : vector<1x32xf32>
    %429 = math.exp %428 : vector<1x32xf32>
    %cst_78 = arith.constant 1.000000e+00 : f32
    %430 = vector.broadcast %cst_78 : f32 to vector<1x32xf32>
    %431 = arith.addf %430, %429 : vector<1x32xf32>
    %432 = arith.divf %430, %431 : vector<1x32xf32>
    %433 = vector.extract_strided_slice %416 {offsets = [0, 64], sizes = [1, 32], strides = [1, 1]} : vector<1x96xf32> to vector<1x32xf32>
    %434 = vector.extract_strided_slice %415 {offsets = [0, 64], sizes = [1, 32], strides = [1, 1]} : vector<1x96xf32> to vector<1x32xf32>
    %435 = arith.mulf %424, %434 : vector<1x32xf32>
    %436 = arith.addf %433, %435 : vector<1x32xf32>
    %437 = math.tanh %436 : vector<1x32xf32>
    %cst_79 = arith.constant 1.000000e+00 : f32
    %438 = vector.broadcast %cst_79 : f32 to vector<1x32xf32>
    %439 = arith.subf %438, %432 : vector<1x32xf32>
    %440 = arith.mulf %439, %437 : vector<1x32xf32>
    %441 = arith.mulf %432, %411 : vector<1x32xf32>
    %442 = arith.addf %440, %441 : vector<1x32xf32>
    %c13 = arith.constant 13 : index
    %c0_80 = arith.constant 0 : index
    %443 = vector.load %arg21[%c13, %c0_80] : memref<16x32xf32, #tpu.memory_space<vmem>>, vector<1x32xf32>
    tpu.vector_store %arg21[%c13, %c0_80], %442 {strides = array<i32>} : memref<16x32xf32, #tpu.memory_space<vmem>>, vector<1x32xf32>,
    %444 = arith.truncf %442 : vector<1x32xf32> to vector<1x32xbf16>
    %cst_81 = arith.constant dense<0.000000e+00> : vector<1x96xf32>
    %445 = tpu.matmul %444, %7, %cst_81 {dimension_numbers = #tpu.dot_dimension_numbers<[1], [0], [0], [1], [0, 0, 1, 1], [], []>} : vector<1x32xbf16>, vector<32x96xbf16>, vector<1x96xf32> -> vector<1x96xf32>
    %446 = arith.addf %445, %8 : vector<1x96xf32>
    %447 = vector.extract_strided_slice %6 {offsets = [14, 0], sizes = [1, 96], strides = [1, 1]} : vector<16x96xf32> to vector<1x96xf32>
    %448 = vector.extract_strided_slice %447 {offsets = [0, 0], sizes = [1, 32], strides = [1, 1]} : vector<1x96xf32> to vector<1x32xf32>
    %449 = vector.extract_strided_slice %446 {offsets = [0, 0], sizes = [1, 32], strides = [1, 1]} : vector<1x96xf32> to vector<1x32xf32>
    %450 = arith.addf %448, %449 : vector<1x32xf32>
    %451 = arith.negf %450 : vector<1x32xf32>
    %452 = math.exp %451 : vector<1x32xf32>
    %cst_82 = arith.constant 1.000000e+00 : f32
    %453 = vector.broadcast %cst_82 : f32 to vector<1x32xf32>
    %454 = arith.addf %453, %452 : vector<1x32xf32>
    %455 = arith.divf %453, %454 : vector<1x32xf32>
    %456 = vector.extract_strided_slice %447 {offsets = [0, 32], sizes = [1, 32], strides = [1, 1]} : vector<1x96xf32> to vector<1x32xf32>
    %457 = vector.extract_strided_slice %446 {offsets = [0, 32], sizes = [1, 32], strides = [1, 1]} : vector<1x96xf32> to vector<1x32xf32>
    %458 = arith.addf %456, %457 : vector<1x32xf32>
    %459 = arith.negf %458 : vector<1x32xf32>
    %460 = math.exp %459 : vector<1x32xf32>
    %cst_83 = arith.constant 1.000000e+00 : f32
    %461 = vector.broadcast %cst_83 : f32 to vector<1x32xf32>
    %462 = arith.addf %461, %460 : vector<1x32xf32>
    %463 = arith.divf %461, %462 : vector<1x32xf32>
    %464 = vector.extract_strided_slice %447 {offsets = [0, 64], sizes = [1, 32], strides = [1, 1]} : vector<1x96xf32> to vector<1x32xf32>
    %465 = vector.extract_strided_slice %446 {offsets = [0, 64], sizes = [1, 32], strides = [1, 1]} : vector<1x96xf32> to vector<1x32xf32>
    %466 = arith.mulf %455, %465 : vector<1x32xf32>
    %467 = arith.addf %464, %466 : vector<1x32xf32>
    %468 = math.tanh %467 : vector<1x32xf32>
    %cst_84 = arith.constant 1.000000e+00 : f32
    %469 = vector.broadcast %cst_84 : f32 to vector<1x32xf32>
    %470 = arith.subf %469, %463 : vector<1x32xf32>
    %471 = arith.mulf %470, %468 : vector<1x32xf32>
    %472 = arith.mulf %463, %442 : vector<1x32xf32>
    %473 = arith.addf %471, %472 : vector<1x32xf32>
    %c14 = arith.constant 14 : index
    %c0_85 = arith.constant 0 : index
    %474 = vector.load %arg21[%c14, %c0_85] : memref<16x32xf32, #tpu.memory_space<vmem>>, vector<1x32xf32>
    tpu.vector_store %arg21[%c14, %c0_85], %473 {strides = array<i32>} : memref<16x32xf32, #tpu.memory_space<vmem>>, vector<1x32xf32>,
    %475 = arith.truncf %473 : vector<1x32xf32> to vector<1x32xbf16>
    %cst_86 = arith.constant dense<0.000000e+00> : vector<1x96xf32>
    %476 = tpu.matmul %475, %7, %cst_86 {dimension_numbers = #tpu.dot_dimension_numbers<[1], [0], [0], [1], [0, 0, 1, 1], [], []>} : vector<1x32xbf16>, vector<32x96xbf16>, vector<1x96xf32> -> vector<1x96xf32>
    %477 = arith.addf %476, %8 : vector<1x96xf32>
    %478 = vector.extract_strided_slice %6 {offsets = [15, 0], sizes = [1, 96], strides = [1, 1]} : vector<16x96xf32> to vector<1x96xf32>
    %479 = vector.extract_strided_slice %478 {offsets = [0, 0], sizes = [1, 32], strides = [1, 1]} : vector<1x96xf32> to vector<1x32xf32>
    %480 = vector.extract_strided_slice %477 {offsets = [0, 0], sizes = [1, 32], strides = [1, 1]} : vector<1x96xf32> to vector<1x32xf32>
    %481 = arith.addf %479, %480 : vector<1x32xf32>
    %482 = arith.negf %481 : vector<1x32xf32>
    %483 = math.exp %482 : vector<1x32xf32>
    %cst_87 = arith.constant 1.000000e+00 : f32
    %484 = vector.broadcast %cst_87 : f32 to vector<1x32xf32>
    %485 = arith.addf %484, %483 : vector<1x32xf32>
    %486 = arith.divf %484, %485 : vector<1x32xf32>
    %487 = vector.extract_strided_slice %478 {offsets = [0, 32], sizes = [1, 32], strides = [1, 1]} : vector<1x96xf32> to vector<1x32xf32>
    %488 = vector.extract_strided_slice %477 {offsets = [0, 32], sizes = [1, 32], strides = [1, 1]} : vector<1x96xf32> to vector<1x32xf32>
    %489 = arith.addf %487, %488 : vector<1x32xf32>
    %490 = arith.negf %489 : vector<1x32xf32>
    %491 = math.exp %490 : vector<1x32xf32>
    %cst_88 = arith.constant 1.000000e+00 : f32
    %492 = vector.broadcast %cst_88 : f32 to vector<1x32xf32>
    %493 = arith.addf %492, %491 : vector<1x32xf32>
    %494 = arith.divf %492, %493 : vector<1x32xf32>
    %495 = vector.extract_strided_slice %478 {offsets = [0, 64], sizes = [1, 32], strides = [1, 1]} : vector<1x96xf32> to vector<1x32xf32>
    %496 = vector.extract_strided_slice %477 {offsets = [0, 64], sizes = [1, 32], strides = [1, 1]} : vector<1x96xf32> to vector<1x32xf32>
    %497 = arith.mulf %486, %496 : vector<1x32xf32>
    %498 = arith.addf %495, %497 : vector<1x32xf32>
    %499 = math.tanh %498 : vector<1x32xf32>
    %cst_89 = arith.constant 1.000000e+00 : f32
    %500 = vector.broadcast %cst_89 : f32 to vector<1x32xf32>
    %501 = arith.subf %500, %494 : vector<1x32xf32>
    %502 = arith.mulf %501, %499 : vector<1x32xf32>
    %503 = arith.mulf %494, %473 : vector<1x32xf32>
    %504 = arith.addf %502, %503 : vector<1x32xf32>
    %c15 = arith.constant 15 : index
    %c0_90 = arith.constant 0 : index
    %505 = vector.load %arg21[%c15, %c0_90] : memref<16x32xf32, #tpu.memory_space<vmem>>, vector<1x32xf32>
    tpu.vector_store %arg21[%c15, %c0_90], %504 {strides = array<i32>} : memref<16x32xf32, #tpu.memory_space<vmem>>, vector<1x32xf32>,
    %c0_91 = arith.constant 0 : index
    %c0_92 = arith.constant 0 : index
    %506 = vector.load %arg1[%c0_91, %c0_92] : memref<16x16xf32, #tpu.memory_space<vmem>>, vector<16x16xf32>
    %507 = arith.truncf %506 : vector<16x16xf32> to vector<16x16xbf16>
    %c0_93 = arith.constant 0 : index
    %c0_94 = arith.constant 0 : index
    %508 = vector.load %arg2[%c0_93, %c0_94] : memref<16x4xf32, #tpu.memory_space<vmem>>, vector<16x4xf32>
    %509 = arith.truncf %508 : vector<16x4xf32> to vector<16x4xbf16>
    %cst_95 = arith.constant dense<0.000000e+00> : vector<16x4xf32>
    %510 = tpu.matmul %507, %509, %cst_95 {dimension_numbers = #tpu.dot_dimension_numbers<[1], [0], [0], [1], [0, 0, 1, 1], [], []>} : vector<16x16xbf16>, vector<16x4xbf16>, vector<16x4xf32> -> vector<16x4xf32>
    %511 = arith.truncf %510 : vector<16x4xf32> to vector<16x4xbf16>
    %c0_96 = arith.constant 0 : index
    %c0_97 = arith.constant 0 : index
    %512 = vector.load %arg7[%c0_96, %c0_97] : memref<4x32xbf16, #tpu.memory_space<vmem>>, vector<4x32xbf16>
    %cst_98 = arith.constant dense<0.000000e+00> : vector<16x32xf32>
    %513 = tpu.matmul %511, %512, %cst_98 {dimension_numbers = #tpu.dot_dimension_numbers<[1], [0], [0], [1], [0, 0, 1, 1], [], []>} : vector<16x4xbf16>, vector<4x32xbf16>, vector<16x32xf32> -> vector<16x32xf32>
    %c0_99 = arith.constant 0 : index
    %c0_100 = arith.constant 0 : index
    %514 = vector.load %arg9[%c0_99, %c0_100] : memref<2x32xf32, #tpu.memory_space<vmem>>, vector<1x32xf32>
    %515 = vector.broadcast %514 : vector<1x32xf32> to vector<16x32xf32>
    %516 = arith.addf %513, %515 : vector<16x32xf32>
    %cst_101 = arith.constant 0.000000e+00 : f32
    %517 = vector.broadcast %cst_101 : f32 to vector<16x32xf32>
    %518 = arith.maximumf %516, %517 : vector<16x32xf32>
    %519 = arith.truncf %518 : vector<16x32xf32> to vector<16x32xbf16>
    %cst_102 = arith.constant dense<0.000000e+00> : vector<16x32xf32>
    %520 = tpu.matmul %507, %519, %cst_102 {dimension_numbers = #tpu.dot_dimension_numbers<[1], [0], [0], [1], [0, 0, 1, 1], [], []>} : vector<16x16xbf16>, vector<16x32xbf16>, vector<16x32xf32> -> vector<16x32xf32>
    %521 = arith.truncf %520 : vector<16x32xf32> to vector<16x32xbf16>
    %c0_103 = arith.constant 0 : index
    %c0_104 = arith.constant 0 : index
    %522 = vector.load %arg8[%c0_103, %c0_104] : memref<32x32xbf16, #tpu.memory_space<vmem>>, vector<32x32xbf16>
    %cst_105 = arith.constant dense<0.000000e+00> : vector<16x32xf32>
    %523 = tpu.matmul %521, %522, %cst_105 {dimension_numbers = #tpu.dot_dimension_numbers<[1], [0], [0], [1], [0, 0, 1, 1], [], []>} : vector<16x32xbf16>, vector<32x32xbf16>, vector<16x32xf32> -> vector<16x32xf32>
    %c1_106 = arith.constant 1 : index
    %c0_107 = arith.constant 0 : index
    %524 = vector.load %arg9[%c1_106, %c0_107] : memref<2x32xf32, #tpu.memory_space<vmem>>, vector<1x32xf32>
    %525 = vector.broadcast %524 : vector<1x32xf32> to vector<16x32xf32>
    %526 = arith.addf %523, %525 : vector<16x32xf32>
    %c0_108 = arith.constant 0 : index
    %c0_109 = arith.constant 0 : index
    %527 = vector.load %arg21[%c0_108, %c0_109] : memref<16x32xf32, #tpu.memory_space<vmem>>, vector<16x32xf32>
    %528 = arith.truncf %527 : vector<16x32xf32> to vector<16x32xbf16>
    %529 = arith.truncf %526 : vector<16x32xf32> to vector<16x32xbf16>
    %c0_110 = arith.constant 0 : index
    %c0_111 = arith.constant 0 : index
    %530 = vector.load %arg10[%c0_110, %c0_111] : memref<32x64xbf16, #tpu.memory_space<vmem>>, vector<32x64xbf16>
    %cst_112 = arith.constant dense<0.000000e+00> : vector<16x64xf32>
    %531 = tpu.matmul %528, %530, %cst_112 {dimension_numbers = #tpu.dot_dimension_numbers<[1], [0], [0], [1], [0, 0, 1, 1], [], []>} : vector<16x32xbf16>, vector<32x64xbf16>, vector<16x64xf32> -> vector<16x64xf32>
    %c0_113 = arith.constant 0 : index
    %c0_114 = arith.constant 0 : index
    %532 = vector.load %arg11[%c0_113, %c0_114] : memref<32x64xbf16, #tpu.memory_space<vmem>>, vector<32x64xbf16>
    %cst_115 = arith.constant dense<0.000000e+00> : vector<16x64xf32>
    %533 = tpu.matmul %529, %532, %cst_115 {dimension_numbers = #tpu.dot_dimension_numbers<[1], [0], [0], [1], [0, 0, 1, 1], [], []>} : vector<16x32xbf16>, vector<32x64xbf16>, vector<16x64xf32> -> vector<16x64xf32>
    %534 = arith.addf %531, %533 : vector<16x64xf32>
    %c0_116 = arith.constant 0 : index
    %c0_117 = arith.constant 0 : index
    %535 = vector.load %arg12[%c0_116, %c0_117] : memref<1x64xf32, #tpu.memory_space<vmem>>, vector<1x64xf32>
    %536 = vector.broadcast %535 : vector<1x64xf32> to vector<16x64xf32>
    %537 = arith.addf %534, %536 : vector<16x64xf32>
    %538 = math.tanh %537 : vector<16x64xf32>
    %c0_118 = arith.constant 0 : index
    %c0_119 = arith.constant 0 : index
    %539 = vector.load %arg13[%c0_118, %c0_119] : memref<1x64xf32, #tpu.memory_space<vmem>>, vector<1x64xf32>
    %540 = vector.broadcast %539 : vector<1x64xf32> to vector<16x64xf32>
    %541 = arith.mulf %538, %540 : vector<16x64xf32>
    %cst_120 = arith.constant dense<0.000000e+00> : vector<16xf32>
    %542 = vector.multi_reduction <add>, %541, %cst_120 [1] : vector<16x64xf32> to vector<16xf32>
    %543 = vector.shape_cast %542 : vector<16xf32> to vector<16x1xf32>
    %cst_121 = arith.constant dense<0xFF800000> : vector<1xf32>
    %544 = vector.multi_reduction <maximumf>, %543, %cst_121 [0] : vector<16x1xf32> to vector<1xf32>
    %545 = vector.shape_cast %544 : vector<1xf32> to vector<1x1xf32>
    %546 = vector.broadcast %545 : vector<1x1xf32> to vector<16x1xf32>
    %547 = arith.subf %543, %546 : vector<16x1xf32>
    %548 = math.exp %547 : vector<16x1xf32>
    %cst_122 = arith.constant dense<0.000000e+00> : vector<1xf32>
    %549 = vector.multi_reduction <add>, %548, %cst_122 [0] : vector<16x1xf32> to vector<1xf32>
    %550 = vector.shape_cast %549 : vector<1xf32> to vector<1x1xf32>
    %551 = tpu.reciprocal %550 {approx = true} : vector<1x1xf32> -> vector<1x1xf32>
    %552 = vector.broadcast %551 : vector<1x1xf32> to vector<16x1xf32>
    %553 = arith.mulf %548, %552 : vector<16x1xf32>
    %554 = vector.broadcast %553 : vector<16x1xf32> to vector<16x32xf32>
    %555 = arith.mulf %554, %527 : vector<16x32xf32>
    %cst_123 = arith.constant dense<0.000000e+00> : vector<32xf32>
    %556 = vector.multi_reduction <add>, %555, %cst_123 [0] : vector<16x32xf32> to vector<32xf32>
    %557 = vector.shape_cast %556 : vector<32xf32> to vector<1x32xf32>
    %558 = vector.broadcast %553 : vector<16x1xf32> to vector<16x32xf32>
    %559 = arith.mulf %558, %526 : vector<16x32xf32>
    %cst_124 = arith.constant dense<0.000000e+00> : vector<32xf32>
    %560 = vector.multi_reduction <add>, %559, %cst_124 [0] : vector<16x32xf32> to vector<32xf32>
    %561 = vector.shape_cast %560 : vector<32xf32> to vector<1x32xf32>
    %562 = arith.truncf %557 : vector<1x32xf32> to vector<1x32xbf16>
    %c0_125 = arith.constant 0 : index
    %c0_126 = arith.constant 0 : index
    %563 = vector.load %arg14[%c0_125, %c0_126] : memref<32x96xbf16, #tpu.memory_space<vmem>>, vector<32x96xbf16>
    %cst_127 = arith.constant dense<0.000000e+00> : vector<1x96xf32>
    %564 = tpu.matmul %562, %563, %cst_127 {dimension_numbers = #tpu.dot_dimension_numbers<[1], [0], [0], [1], [0, 0, 1, 1], [], []>} : vector<1x32xbf16>, vector<32x96xbf16>, vector<1x96xf32> -> vector<1x96xf32>
    %565 = arith.truncf %561 : vector<1x32xf32> to vector<1x32xbf16>
    %c0_128 = arith.constant 0 : index
    %c0_129 = arith.constant 0 : index
    %566 = vector.load %arg15[%c0_128, %c0_129] : memref<32x96xbf16, #tpu.memory_space<vmem>>, vector<32x96xbf16>
    %cst_130 = arith.constant dense<0.000000e+00> : vector<1x96xf32>
    %567 = tpu.matmul %565, %566, %cst_130 {dimension_numbers = #tpu.dot_dimension_numbers<[1], [0], [0], [1], [0, 0, 1, 1], [], []>} : vector<1x32xbf16>, vector<32x96xbf16>, vector<1x96xf32> -> vector<1x96xf32>
    %568 = arith.addf %564, %567 : vector<1x96xf32>
    %c0_131 = arith.constant 0 : index
    %c0_132 = arith.constant 0 : index
    %569 = vector.load %arg16[%c0_131, %c0_132] : memref<1x96xf32, #tpu.memory_space<vmem>>, vector<1x96xf32>
    %570 = arith.addf %568, %569 : vector<1x96xf32>
    %c0_133 = arith.constant 0 : index
    %c0_134 = arith.constant 0 : index
    %571 = vector.load %arg17[%c0_133, %c0_134] : memref<1x96xf32, #tpu.memory_space<vmem>>, vector<1x96xf32>
    %572 = vector.extract_strided_slice %570 {offsets = [0, 0], sizes = [1, 32], strides = [1, 1]} : vector<1x96xf32> to vector<1x32xf32>
    %573 = vector.extract_strided_slice %571 {offsets = [0, 0], sizes = [1, 32], strides = [1, 1]} : vector<1x96xf32> to vector<1x32xf32>
    %574 = arith.addf %572, %573 : vector<1x32xf32>
    %575 = arith.negf %574 : vector<1x32xf32>
    %576 = math.exp %575 : vector<1x32xf32>
    %cst_135 = arith.constant 1.000000e+00 : f32
    %577 = vector.broadcast %cst_135 : f32 to vector<1x32xf32>
    %578 = arith.addf %577, %576 : vector<1x32xf32>
    %579 = arith.divf %577, %578 : vector<1x32xf32>
    %580 = vector.extract_strided_slice %570 {offsets = [0, 32], sizes = [1, 32], strides = [1, 1]} : vector<1x96xf32> to vector<1x32xf32>
    %581 = vector.extract_strided_slice %571 {offsets = [0, 32], sizes = [1, 32], strides = [1, 1]} : vector<1x96xf32> to vector<1x32xf32>
    %582 = arith.addf %580, %581 : vector<1x32xf32>
    %583 = arith.negf %582 : vector<1x32xf32>
    %584 = math.exp %583 : vector<1x32xf32>
    %cst_136 = arith.constant 1.000000e+00 : f32
    %585 = vector.broadcast %cst_136 : f32 to vector<1x32xf32>
    %586 = arith.addf %585, %584 : vector<1x32xf32>
    %587 = arith.divf %585, %586 : vector<1x32xf32>
    %588 = vector.extract_strided_slice %570 {offsets = [0, 64], sizes = [1, 32], strides = [1, 1]} : vector<1x96xf32> to vector<1x32xf32>
    %589 = vector.extract_strided_slice %571 {offsets = [0, 64], sizes = [1, 32], strides = [1, 1]} : vector<1x96xf32> to vector<1x32xf32>
    %590 = arith.mulf %579, %589 : vector<1x32xf32>
    %591 = arith.addf %588, %590 : vector<1x32xf32>
    %592 = math.tanh %591 : vector<1x32xf32>
    %cst_137 = arith.constant 1.000000e+00 : f32
    %593 = vector.broadcast %cst_137 : f32 to vector<1x32xf32>
    %594 = arith.subf %593, %587 : vector<1x32xf32>
    %595 = arith.mulf %594, %592 : vector<1x32xf32>
    %596 = arith.truncf %595 : vector<1x32xf32> to vector<1x32xbf16>
    %c0_138 = arith.constant 0 : index
    %c0_139 = arith.constant 0 : index
    %597 = vector.load %arg18[%c0_138, %c0_139] : memref<32x8xbf16, #tpu.memory_space<vmem>>, vector<32x8xbf16>
    %cst_140 = arith.constant dense<0.000000e+00> : vector<1x8xf32>
    %598 = tpu.matmul %596, %597, %cst_140 {dimension_numbers = #tpu.dot_dimension_numbers<[1], [0], [0], [1], [0, 0, 1, 1], [], []>} : vector<1x32xbf16>, vector<32x8xbf16>, vector<1x8xf32> -> vector<1x8xf32>
    %c0_141 = arith.constant 0 : index
    %c0_142 = arith.constant 0 : index
    %599 = vector.load %arg19[%c0_141, %c0_142] : memref<1x8xf32, #tpu.memory_space<vmem>>, vector<1x8xf32>
    %600 = arith.addf %598, %599 : vector<1x8xf32>
    %c0_143 = arith.constant 0 : index
    %c0_144 = arith.constant 0 : index
    %601 = vector.load %arg20[%c0_143, %c0_144] : memref<1x8xf32, #tpu.memory_space<vmem>>, vector<1x8xf32>
    tpu.vector_store %arg20[%c0_143, %c0_144], %600 {strides = array<i32>} : memref<1x8xf32, #tpu.memory_space<vmem>>, vector<1x8xf32>,
    return
  }
}

</mosaic_0001>

<bundles_post_ra>
// kernel: antibody_forward.1
= control target key start
LH: loop header
LB: loop body
LE: loop exit
PB: predicated region body
PF: predicated region fallthrough
CT: control target
= control target key end

     0   :  { %s3548_s0 = inlined_call_operand.vmem [shape: f32[16,8], index: 0, kind: input, shape index: {}]   ;;  %s3549_s1 = inlined_call_operand.vmem [shape: f32[16,16], index: 1, kind: input, shape index: {}]   ;;  %s3550_s2 = inlined_call_operand.vmem [shape: f32[16,4], index: 2, kind: input, shape index: {}]   ;;  %s3551_s3 = inlined_call_operand.vmem [shape: bf16[8,96], index: 3, kind: input, shape index: {}]   ;;  %s3552_s4 = inlined_call_operand.vmem [shape: bf16[32,96], index: 4, kind: input, shape index: {}]   ;;  %s3553_s5 = inlined_call_operand.vmem [shape: f32[1,96], index: 5, kind: input, shape index: {}]   ;;  %s3554_s6 = inlined_call_operand.hbm [shape: f32[1,96], index: 6, kind: input, shape index: {}]   ;;  %s3555_s7 = inlined_call_operand.vmem [shape: bf16[4,32], index: 7, kind: input, shape index: {}]   ;;  %s3556_s8 = inlined_call_operand.vmem [shape: bf16[32,32], index: 8, kind: input, shape index: {}]   ;;  %s3557_s9 = inlined_call_operand.vmem [shape: f32[2,32], index: 9, kind: input, shape index: {}]   ;;  %s3558_s10 = inlined_call_operand.vmem [shape: bf16[32,64], index: 10, kind: input, shape index: {}]   ;;  %s3559_s11 = inlined_call_operand.vmem [shape: bf16[32,64], index: 11, kind: input, shape index: {}]   ;;  %s3560_s12 = inlined_call_operand.hbm [shape: f32[1,64], index: 12, kind: input, shape index: {}]   ;;  %s3561_s13 = inlined_call_operand.hbm [shape: f32[1,64], index: 13, kind: input, shape index: {}]   ;;  %s3562_s14 = inlined_call_operand.vmem [shape: bf16[32,96], index: 14, kind: input, shape index: {}]   ;;  %s3563_s15 = inlined_call_operand.hbm [shape: bf16[32,96], index: 15, kind: input, shape index: {}]   ;;  %s3564_s16 = inlined_call_operand.hbm [shape: f32[1,96], index: 16, kind: input, shape index: {}]   ;;  %s3565_s17 = inlined_call_operand.hbm [shape: f32[1,96], index: 17, kind: input, shape index: {}]   ;;  %s3566_s18 = inlined_call_operand.vmem [shape: bf16[32,8], index: 18, kind: input, shape index: {}]   ;;  %s3567_s19 = inlined_call_operand.vmem [shape: f32[1,8], index: 19, kind: input, shape index: {}]   ;;  %s3568_s20 = inlined_call_operand.hbm [shape: f32[1,8], index: 20, kind: output, shape index: {}]  }
   0x1   :  { %3573 = sst [smem:[#allocation20_spill]] %s3548_s0 }
   0x2   :  { %3574 = sst [smem:[#allocation21_spill]] %s3549_s1 }
   0x3   :  { %3575 = sst [smem:[#allocation22_spill]] %s3550_s2 }
   0x4   :  { %3576 = sst [smem:[#allocation23_spill]] %s3551_s3 }
   0x5   :  { %3577 = sst [smem:[#allocation24_spill]] %s3552_s4 }
   0x6   :  { %25 = vsyncpa [#allocation4], 0 }
   0x7   :  { %26 = vsyncpa [#allocation7], 0 }
   0x8   :  { %27 = vsyncpa [#allocation10], 0 }
   0x9   :  { %28 = vsyncpa [#allocation13], 0 }
   0xa   :  { %29 = vsyncpa [#allocation5], 0  ;;  %s2841_s1 = smov [#allocation6]   ;;  %s2842_s23 = smov [#allocation9]  }
   0xb   :  { %s68_s22 = sshll.u32 %s2841_s1, 4  ;;  %s89_s24 = sshll.u32 %s2842_s23, 4  ;;  %s69_s22 = int_to_ptr.vmem [resolvable:$true] %s68_s22  ;;  %s2959_s24 = int_to_ptr.vmem [resolvable:$true] %s89_s24 }
   0xc   :  { %s2677_s3 = scalar_lea.hbm %s3560_s12, 16 }
   0xd   :  { %p2678_p0 = scmp.ne.s32.totalorder %s3560_s12, %s2677_s3  ;;  %p2681_p1 = scmp.lt.u32.totalorder %s2677_s3, %s3560_s12 }
   0xf   :  { %p2683_p2 = pnand %p2681_p1, %p2678_p0 }
  0x11   :  { %2686 = shalt.err (!%p2683_p2)
}
  0x12   :  { %s2687_s29 = scalar_lea.vmem %s69_s22, 16  ;;  %s2691_s30 = scalar_lea.vmem %s69_s22, 32 }
  0x13   :  { %p2688_p3 = scmp.ne.s32.totalorder %s69_s22, %s2687_s29  ;;  %p2692_p4 = scmp.lt.s32.totalorder %s69_s22, %s69_s22 }
  0x14   :  { %p2693_p5 = scmp.lt.s32.totalorder %s2691_s30, %s2687_s29 }
  0x16   :  { %p2694_p6 = por %p2693_p5, %p2692_p4 }
  0x18   :  { %p2695_p7 = pnand %p2694_p6, %p2688_p3 }
  0x1a   :  { %2698 = shalt.err (!%p2695_p7)
}
  0x1b   :  { %71 = dma.hbm_to_vmem [thread:$0]  %s3560_s12, 16, %s69_s22, [#allocation7]  }
  0x1c   :  { %s2699_s2 = scalar_lea.hbm %s3563_s15, 256 }
  0x1d   :  { %p2700_p8 = scmp.ne.s32.totalorder %s3563_s15, %s2699_s2  ;;  %p2703_p9 = scmp.lt.u32.totalorder %s2699_s2, %s3563_s15 }
  0x1f   :  { %p2705_p10 = pnand %p2703_p9, %p2700_p8 }
  0x21   :  { %2708 = shalt.err (!%p2705_p10)
}
  0x22   :  { %s2709_s28 = scalar_lea.vmem %s2959_s24, 256  ;;  %p2714_p12 = scmp.lt.s32.totalorder %s2959_s24, %s2959_s24 }
  0x23   :  { %p2710_p11 = scmp.ne.s32.totalorder %s2959_s24, %s2709_s28  ;;  %p2715_p13 = scmp.lt.s32.totalorder %s2709_s28, %s2709_s28 }
  0x25   :  { %p2716_p0 = por %p2715_p13, %p2714_p12 }
  0x27   :  { %p2717_p1 = pnand %p2716_p0, %p2710_p11 }
  0x29   :  { %2720 = shalt.err (!%p2717_p1)
}
  0x2a   :  { %s2843_s12 = smov 64   ;;  %s2844_s22 = smov 4  }
  0x2b   :  { %95 = dma.hbm_to_vmem [thread:$0]  %s3563_s15, 256, %s2959_s24, [#allocation10], %s2843_s12, %s2843_s12, %s2844_s22  }
  0x2c   :  { %s2845_s30 = smov [#allocation3]   ;;  %s2846_s21 = smov [#allocation8]  }
  0x2d   :  { %s48_s0 = sshll.u32 %s2845_s30, 4  ;;  %s78_s1 = sshll.u32 %s2846_s21, 4  ;;  %s49_s0 = int_to_ptr.vmem [resolvable:$true] %s48_s0  ;;  %s79_s1 = int_to_ptr.vmem [resolvable:$true] %s78_s1 }
  0x2e   :  { %s2721_s25 = scalar_lea.hbm %s3554_s6, 16 }
  0x2f   :  { %p2722_p2 = scmp.ne.s32.totalorder %s3554_s6, %s2721_s25  ;;  %p2725_p3 = scmp.lt.u32.totalorder %s2721_s25, %s3554_s6 }
  0x31   :  { %p2727_p4 = pnand %p2725_p3, %p2722_p2 }
  0x33   :  { %2730 = shalt.err (!%p2727_p4)
}
  0x34   :  { %s2731_s15 = scalar_lea.vmem %s49_s0, 16  ;;  %s2735_s24 = scalar_lea.vmem %s49_s0, 32 }
  0x35   :  { %p2732_p5 = scmp.ne.s32.totalorder %s49_s0, %s2731_s15  ;;  %p2736_p6 = scmp.lt.s32.totalorder %s49_s0, %s49_s0 }
  0x36   :  { %p2737_p7 = scmp.lt.s32.totalorder %s2735_s24, %s2731_s15 }
  0x38   :  { %p2738_p8 = por %p2737_p7, %p2736_p6 }
  0x3a   :  { %p2739_p9 = pnand %p2738_p8, %p2732_p5 }
  0x3c   :  { %2742 = shalt.err (!%p2739_p9)
}
  0x3d   :  { %51 = dma.hbm_to_vmem [thread:$0]  %s3554_s6, 16, %s49_s0, [#allocation4]  }
  0x3e   :  { %s2743_s21 = scalar_lea.hbm %s3561_s13, 16 }
  0x3f   :  { %p2744_p10 = scmp.ne.s32.totalorder %s3561_s13, %s2743_s21  ;;  %p2747_p11 = scmp.lt.u32.totalorder %s2743_s21, %s3561_s13 }
  0x41   :  { %p2749_p12 = pnand %p2747_p11, %p2744_p10 }
  0x43   :  { %2752 = shalt.err (!%p2749_p12)
}
  0x44   :  { %s2753_s26 = scalar_lea.vmem %s79_s1, 16  ;;  %s2757_s27 = scalar_lea.vmem %s79_s1, 32 }
  0x45   :  { %p2754_p13 = scmp.ne.s32.totalorder %s79_s1, %s2753_s26  ;;  %p2758_p0 = scmp.lt.s32.totalorder %s79_s1, %s79_s1 }
  0x46   :  { %p2759_p1 = scmp.lt.s32.totalorder %s2757_s27, %s2753_s26 }
  0x48   :  { %p2760_p2 = por %p2759_p1, %p2758_p0 }
  0x4a   :  { %p2761_p3 = pnand %p2760_p2, %p2754_p13 }
  0x4c   :  { %2764 = shalt.err (!%p2761_p3)
}
  0x4d   :  { %81 = dma.hbm_to_vmem [thread:$0]  %s3561_s13, 16, %s79_s1, [#allocation7]  }
  0x4e   :  { %s2847_s28 = smov [#allocation11]   ;;  %s2848_s24 = smov [#allocation12]  }
  0x4f   :  { %s102_s15 = sshll.u32 %s2847_s28, 4  ;;  %s112_s22 = sshll.u32 %s2848_s24, 4  ;;  %s103_s15 = int_to_ptr.vmem [resolvable:$true] %s102_s15  ;;  %s113_s22 = int_to_ptr.vmem [resolvable:$true] %s112_s22 }
  0x50   :  { %s2765_s30 = scalar_lea.hbm %s3564_s16, 16 }
  0x51   :  { %p2766_p4 = scmp.ne.s32.totalorder %s3564_s16, %s2765_s30  ;;  %p2769_p5 = scmp.lt.u32.totalorder %s2765_s30, %s3564_s16 }
  0x53   :  { %p2771_p6 = pnand %p2769_p5, %p2766_p4 }
  0x55   :  { %2774 = shalt.err (!%p2771_p6)
}
  0x56   :  { %s2775_s13 = scalar_lea.vmem %s103_s15, 16  ;;  %s2779_s1 = scalar_lea.vmem %s103_s15, 32 }
  0x57   :  { %p2776_p7 = scmp.ne.s32.totalorder %s103_s15, %s2775_s13  ;;  %p2780_p8 = scmp.lt.s32.totalorder %s103_s15, %s103_s15 }
  0x58   :  { %p2781_p9 = scmp.lt.s32.totalorder %s2779_s1, %s2775_s13 }
  0x5a   :  { %p2782_p10 = por %p2781_p9, %p2780_p8 }
  0x5c   :  { %p2783_p11 = pnand %p2782_p10, %p2776_p7 }
  0x5e   :  { %2786 = shalt.err (!%p2783_p11)
}
  0x5f   :  { %105 = dma.hbm_to_vmem [thread:$0]  %s3564_s16, 16, %s103_s15, [#allocation10]  }
  0x60   :  { %s2787_s0 = scalar_lea.hbm %s3565_s17, 16 }
  0x61   :  { %p2788_p12 = scmp.ne.s32.totalorder %s3565_s17, %s2787_s0  ;;  %p2791_p13 = scmp.lt.u32.totalorder %s2787_s0, %s3565_s17 }
  0x63   :  { %p2793_p0 = pnand %p2791_p13, %p2788_p12 }
  0x65   :  { %2796 = shalt.err (!%p2793_p0)
}
  0x66   :  { %s2797_s30 = scalar_lea.vmem %s113_s22, 16  ;;  %s2801_s21 = scalar_lea.vmem %s113_s22, 32 }
  0x67   :  { %p2798_p1 = scmp.ne.s32.totalorder %s113_s22, %s2797_s30  ;;  %p2802_p2 = scmp.lt.s32.totalorder %s113_s22, %s113_s22 }
  0x68   :  { %p2803_p3 = scmp.lt.s32.totalorder %s2801_s21, %s2797_s30 }
  0x6a   :  { %p2804_p4 = por %p2803_p3, %p2802_p2 }
  0x6c   :  { %p2805_p5 = pnand %p2804_p4, %p2798_p1 }
  0x6e   :  { %2808 = shalt.err (!%p2805_p5)
}
  0x6f   :  { %115 = dma.hbm_to_vmem [thread:$0]  %s3565_s17, 16, %s113_s22, [#allocation13]  }
  0x70   :  { %2831 = dma.done.wait [#allocation4], 16  }
  0x71   :  { %2832 = vsyncadd [#allocation4], 4294967280 }
  0x72   :  { %2833 = dma.done.wait [#allocation7], 32  }
  0x73   :  { %2834 = vsyncadd [#allocation7], 4294967264 }
  0x74   :  { %2835 = dma.done.wait [#allocation10], 272  }
  0x75   :  { %2836 = vsyncadd [#allocation10], 4294967024 }
  0x76   :  { %2837 = dma.done.wait [#allocation13], 16  }
  0x77   :  { %2838 = vsyncadd [#allocation13], 4294967280  ;;  %v2849_v0 = vmov 0.0   ;;  %vm2850_vm0 = vmmov 0   ;;  %vm154_vm1 = vcmask 1043456   ;;  %s3578_s23 = sld [smem:[#allocation24_spill]] }
  0x78   :  { %2341 = vmatprep.subr.bf16.mxu1 %v2849_v0  ;;  %2335 = vmatprep.subr.bf16.mxu0 %v2849_v0  ;;  %s3579_s13 = sld [smem:[#allocation23_spill]]  ;;  %s3580_s6 = sld [smem:[#allocation20_spill]]  ;;  %vm150_vm2 = vcmask 64512   ;;  %v2851_v8 = vmov 0   ;;  %v3082_v10 = vld [vmem:[#allocation3] sm:$0x1] }
  0x79   :  { %2337 = vmatprep.mubr.msk.bf16.mxu0 %vm2850_vm0, %v2849_v0  ;;  %2345 = vmatprep.mubr.msk.bf16.mxu1 %vm2850_vm0, %v2849_v0  ;;  %v2200_v12 = vld [vmem:[%s3553_s5] ss:$0 sm:$0xff]  ;;  %s2852_s5 = smov 96   ;;  %vm216_vm3 = vcmask 261120   ;;  %s3581_s22 = sld [smem:[#allocation22_spill]]  ;;  %vm1558_vm4 = vcmask 130048  }
  0x7a   :  { %s3582_s1 = sld [smem:[#allocation21_spill]]  ;;  %vm1614_vm5 = vcmask 1041408   ;;  %vm1610_vm6 = vcmask 31744   ;;  %vm290_vm7 = vcmask 253952   ;;  %vm458_vm8 = vcmask 256002  }
  0x7b   :  { %vm628_vm9 = vcmask 258052   ;;  %vm798_vm10 = vcmask 260102   ;;  %vm373_vm11 = vcmask 254977   ;;  %vm542_vm12 = vcmask 257027  }
  0x7c   :  { %vm712_vm13 = vcmask 259077   ;;  %vm882_vm14 = vcmask 261127   ;;  %vm1913_vm15 = vcmask 523264  }
  0x7d   :  { %v3049_v1 = vld [vmem:[%s3578_s23] sm:$0xff]   ;;  %v3058_v4 = vld [vmem:[%s3578_s23 + $0x8] sm:$0xff]  }
  0x7e   :  { %v142_v2 = vld [vmem:[%s3579_s13] sm:$0xf]  ;;  %2342 = vmatpush3.bf16.msra.mxu1 %v3049_v1  ;;  %v140_v6 = vld [vmem:[%s3580_s6 + $0x8] sm:$0xff] }
  0x7f   :  { %v156_v3 = vsel %vm154_vm1, %v142_v2, 0  ;;  %v139_v5 = vld [vmem:[%s3580_s6] sm:$0xff]  ;;  %2343 = vmatprep.subr.bf16.mxu1 %v2849_v0 }
  0x80   :  { %2336 = vmatpush3.bf16.msra.mxu0 %v156_v3  ;;  %v141_v7 = vpack.c.bf16 %v140_v6, %v139_v5 }
  0x81   :  { %2349 = vmatprep.subr.bf16.mxu0 %v2849_v0 }
  0x82   :  { %2344 = vmatpush3.bf16.msra.mxu1 %v3058_v4 }
  0x83   :  { %2338 = vmatmul.mubr.msk.bf16.vlgmr.msra.gmra.mrb[0].mxu0 %vm150_vm2, %v141_v7  ;;  %2357 = vmatprep.subr.bf16.mxu1 %v2849_v0 }
  0x84   :  { %2350 = vmatpush3.bf16.msra.mxu0 %v3049_v1  ;;  %2353 = vmatprep.mubr.msk.bf16.mxu0 %vm2850_vm0, %v2849_v0 }
  0x85   :  { %2351 = vmatprep.subr.bf16.mxu0 %v2849_v0  ;;  %2346 = vmatmul.mubr.bf16.vlgmr.msra.gmra.mrb[0].mxu1 %v2851_v8 }
  0x86   :  { %2358 = vmatpush3.bf16.msra.mxu1 %v3049_v1  ;;  %2361 = vmatprep.mubr.msk.bf16.mxu1 %vm2850_vm0, %v2849_v0 }
  0x87   :  { %2359 = vmatprep.subr.bf16.mxu1 %v2849_v0 }
  0x88   :  { %2352 = vmatpush3.bf16.msra.mxu0 %v3058_v4 }
  0x89   :  { %2365 = vmatprep.subr.bf16.mxu0 %v2849_v0 }
  0x8a   :  { %2360 = vmatpush3.bf16.msra.mxu1 %v3058_v4 }
  0x8b   :  { %2373 = vmatprep.subr.bf16.mxu1 %v2849_v0 }
 0x156   :  { %v192_v9 = vpop.f32.mrb[0].mxu0 }
 0x157   :  { %v2339_v11 = vpop.f32.mrb[1].mxu0  ;;  %v3091_v21 = vadd.f32 %v2200_v12, %v192_v9 }
 0x158   :  { %v195_v13 = vpop.f32.mrb[2].mxu0  ;;  %v254_v14 = vpop.f32.mrb[0].mxu1 }
 0x159   :  { %v3087_v15 = vadd.f32 %v2200_v12, %v195_v13  ;;  %v2340_v16 = vpop.f32.mrb[3].mxu0  ;;  %v255_v17 = vadd.f32 %v254_v14, %v3082_v10  ;;  %v2347_v18 = vpop.f32.mrb[1].mxu1 }
 0x15a   :  { %v257_v19 = vpop.f32.mrb[2].mxu1 }
 0x15b   :  { %268 = vrot.lane.b32.xlu0 %v255_v17, %s2843_s12  ;;  %v2348_v20 = vpop.f32.mrb[3].mxu1  ;;  %v260_v22 = vadd.f32 %v255_v17, %v3091_v21 }
 0x15d   :  { %v2204_v23 = vmul.f32 -1.442695, %v260_v22 }
 0x15f   :  { %2562 = vpow2.f32 %v2204_v23 }
 0x169   :  { %v2563_v24 = vpop.eup %2562 }
 0x16a   :  { %v264_v25 = vadd.f32 1.0, %v2563_v24 }
 0x16c   :  { %2564 = vrcp.f32 %v264_v25 }
 0x176   :  { %v2565_v26 = vpop.eup %2564 }
 0x177   :  { %v278_v32 = vsub.f32 1.0, %v2565_v26  ;;  %v284_v34 = vmul.f32 0.0, %v2565_v26 }
 0x1cd   :  { %v269_v27 = vpop.permute.xlu0 %268 }
 0x1ce   :  { %v271_v28 = vmul.f32 %v2565_v26, %v269_v27 }
 0x1d0   :  { %273 = vrot.lane.b32.xlu0 %v271_v28, %s2843_s12 }
 0x242   :  { %v274_v29 = vpop.permute.xlu0 %273 }
 0x243   :  { %v276_v30 = vadd.f32 %v274_v29, %v3091_v21 }
 0x245   :  { %2566 = vtanh.f32 %v276_v30 }
 0x24f   :  { %v2567_v31 = vpop.eup %2566 }
 0x250   :  { %280 = vrot.lane.b32.xlu1 %v2567_v31, %s2852_s5 }
 0x2c2   :  { %v281_v33 = vpop.permute.xlu1 %280 }
 0x2c3   :  { %v283_v35 = vmul.f32 %v281_v33, %v278_v32 }
 0x2c5   :  { %v3097_v36 = vadd.f32 %v284_v34, %v283_v35 }
 0x2c7   :  { %v292_v37 = vpack.c.bf16 %v3097_v36, %v3097_v36  ;;  %v365_v56 = vrot.slane %v3097_v36, 7 }
 0x2c9   :  { %294 = vrot.lane.b32.xlu1 %v292_v37, %s2852_s5 }
 0x33b   :  { %v295_v38 = vpop.permute.xlu1 %294 }
 0x33c   :  { %2354 = vmatmul.mubr.msk.bf16.vlgmr.msra.gmra.mrb[4].mxu0 %vm216_vm3, %v295_v38 }
 0x33d   :  { %2366 = vmatpush3.bf16.msra.mxu0 %v3049_v1  ;;  %2369 = vmatprep.mubr.msk.bf16.mxu0 %vm2850_vm0, %v2849_v0 }
 0x33e   :  { %2367 = vmatprep.subr.bf16.mxu0 %v2849_v0 }
 0x341   :  { %2368 = vmatpush3.bf16.msra.mxu0 %v3058_v4 }
 0x342   :  { %2381 = vmatprep.subr.bf16.mxu0 %v2849_v0 }
 0x40f   :  { %v333_v39 = vpop.f32.mrb[4].mxu0 }
 0x410   :  { %v334_v40 = vadd.f32 %v333_v39, %v3082_v10  ;;  %v2355_v41 = vpop.f32.mrb[5].mxu0 }
 0x411   :  { %v336_v42 = vpop.f32.mrb[6].mxu0 }
 0x412   :  { %v340_v43 = vrot.slane %v334_v40, 7  ;;  %v2356_v44 = vpop.f32.mrb[7].mxu0 }
 0x414   :  { %349 = vrot.lane.b32.xlu0 %v340_v43, %s2843_s12  ;;  %v342_v45 = vadd.f32 %v340_v43, %v3091_v21 }
 0x416   :  { %v2206_v46 = vmul.f32 -1.442695, %v342_v45 }
 0x418   :  { %2568 = vpow2.f32 %v2206_v46 }
 0x422   :  { %v2569_v47 = vpop.eup %2568 }
 0x423   :  { %v346_v48 = vadd.f32 1.0, %v2569_v47 }
 0x425   :  { %2570 = vrcp.f32 %v346_v48 }
 0x42f   :  { %v2571_v49 = vpop.eup %2570 }
 0x430   :  { %v359_v55 = vsub.f32 1.0, %v2571_v49  ;;  %v367_v58 = vmul.f32 %v2571_v49, %v365_v56 }
 0x486   :  { %v350_v50 = vpop.permute.xlu0 %349 }
 0x487   :  { %v352_v51 = vmul.f32 %v2571_v49, %v350_v50 }
 0x489   :  { %354 = vrot.lane.b32.xlu1 %v352_v51, %s2843_s12 }
 0x4fb   :  { %v355_v52 = vpop.permute.xlu1 %354 }
 0x4fc   :  { %v357_v53 = vadd.f32 %v355_v52, %v3091_v21 }
 0x4fe   :  { %2572 = vtanh.f32 %v357_v53 }
 0x508   :  { %v2573_v54 = vpop.eup %2572 }
 0x509   :  { %361 = vrot.lane.b32.xlu0 %v2573_v54, %s2852_s5 }
 0x57b   :  { %v362_v57 = vpop.permute.xlu0 %361 }
 0x57c   :  { %v364_v59 = vmul.f32 %v362_v57, %v359_v55 }
 0x57e   :  { %v3116_v60 = vadd.f32 %v367_v58, %v364_v59 }
 0x580   :  { %v375_v61 = vpack.c.bf16 %v3116_v60, %v3116_v60  ;;  %v450_v23 = vrot.slane %v3116_v60, 7 }
 0x582   :  { %v377_v62 = vshrl.u32 %v375_v61, 16 }
 0x584   :  { %379 = vrot.lane.b32.xlu1 %v377_v62, %s2852_s5 }
 0x5f6   :  { %v380_v63 = vpop.permute.xlu1 %379 }
 0x5f7   :  { %2362 = vmatmul.mubr.msk.bf16.vlgmr.msra.gmra.mrb[4].mxu1 %vm216_vm3, %v380_v63 }
 0x5f8   :  { %2374 = vmatpush3.bf16.msra.mxu1 %v3049_v1  ;;  %2377 = vmatprep.mubr.msk.bf16.mxu1 %vm2850_vm0, %v2849_v0 }
 0x5f9   :  { %2375 = vmatprep.subr.bf16.mxu1 %v2849_v0 }
 0x5fc   :  { %2376 = vmatpush3.bf16.msra.mxu1 %v3058_v4 }
 0x5fd   :  { %2389 = vmatprep.subr.bf16.mxu1 %v2849_v0 }
 0x6ca   :  { %v418_v2 = vpop.f32.mrb[4].mxu1 }
 0x6cb   :  { %v419_v3 = vadd.f32 %v418_v2, %v3082_v10  ;;  %v2363_v5 = vpop.f32.mrb[5].mxu1 }
 0x6cc   :  { %v421_v6 = vpop.f32.mrb[6].mxu1 }
 0x6cd   :  { %v425_v7 = vrot.slane %v419_v3, 6  ;;  %v2364_v8 = vpop.f32.mrb[7].mxu1 }
 0x6cf   :  { %434 = vrot.lane.b32.xlu0 %v425_v7, %s2843_s12  ;;  %v427_v9 = vadd.f32 %v425_v7, %v3091_v21 }
 0x6d1   :  { %v2208_v11 = vmul.f32 -1.442695, %v427_v9 }
 0x6d3   :  { %2574 = vpow2.f32 %v2208_v11 }
 0x6dd   :  { %v2575_v12 = vpop.eup %2574 }
 0x6de   :  { %v431_v13 = vadd.f32 1.0, %v2575_v12 }
 0x6e0   :  { %2576 = vrcp.f32 %v431_v13 }
 0x6ea   :  { %v2577_v14 = vpop.eup %2576 }
 0x6eb   :  { %v444_v22 = vsub.f32 1.0, %v2577_v14  ;;  %v452_v25 = vmul.f32 %v2577_v14, %v450_v23 }
 0x741   :  { %v435_v16 = vpop.permute.xlu0 %434 }
 0x742   :  { %v437_v17 = vmul.f32 %v2577_v14, %v435_v16 }
 0x744   :  { %439 = vrot.lane.b32.xlu1 %v437_v17, %s2843_s12 }
 0x7b6   :  { %v440_v18 = vpop.permute.xlu1 %439 }
 0x7b7   :  { %v442_v19 = vadd.f32 %v440_v18, %v3091_v21 }
 0x7b9   :  { %2578 = vtanh.f32 %v442_v19 }
 0x7c3   :  { %v2579_v20 = vpop.eup %2578 }
 0x7c4   :  { %446 = vrot.lane.b32.xlu0 %v2579_v20, %s2852_s5 }
 0x836   :  { %v447_v24 = vpop.permute.xlu0 %446 }
 0x837   :  { %v449_v26 = vmul.f32 %v447_v24, %v444_v22 }
 0x839   :  { %v3135_v27 = vadd.f32 %v452_v25, %v449_v26 }
 0x83b   :  { %v460_v28 = vpack.c.bf16 %v3135_v27, %v3135_v27  ;;  %v534_v49 = vrot.slane %v3135_v27, 7 }
 0x83d   :  { %v462_v29 = vrot.slane %v460_v28, 1 }
 0x83f   :  { %463 = vrot.lane.b32.xlu1 %v462_v29, %s2852_s5 }
 0x8b1   :  { %v464_v30 = vpop.permute.xlu1 %463 }
 0x8b2   :  { %2370 = vmatmul.mubr.msk.bf16.vlgmr.msra.gmra.mrb[8].mxu0 %vm216_vm3, %v464_v30 }
 0x8b3   :  { %2382 = vmatpush3.bf16.msra.mxu0 %v3049_v1  ;;  %2385 = vmatprep.mubr.msk.bf16.mxu0 %vm2850_vm0, %v2849_v0 }
 0x8b4   :  { %2383 = vmatprep.subr.bf16.mxu0 %v2849_v0 }
 0x8b7   :  { %2384 = vmatpush3.bf16.msra.mxu0 %v3058_v4 }
 0x8b8   :  { %2397 = vmatprep.subr.bf16.mxu0 %v2849_v0 }
 0x985   :  { %v502_v31 = vpop.f32.mrb[8].mxu0 }
 0x986   :  { %v503_v32 = vadd.f32 %v502_v31, %v3082_v10  ;;  %v2371_v33 = vpop.f32.mrb[9].mxu0 }
 0x987   :  { %v505_v34 = vpop.f32.mrb[10].mxu0 }
 0x988   :  { %v509_v35 = vrot.slane %v503_v32, 5  ;;  %v2372_v37 = vpop.f32.mrb[11].mxu0 }
 0x98a   :  { %518 = vrot.lane.b32.xlu0 %v509_v35, %s2843_s12  ;;  %v511_v38 = vadd.f32 %v509_v35, %v3091_v21 }
 0x98c   :  { %v2210_v39 = vmul.f32 -1.442695, %v511_v38 }
 0x98e   :  { %2580 = vpow2.f32 %v2210_v39 }
 0x998   :  { %v2581_v40 = vpop.eup %2580 }
 0x999   :  { %v515_v41 = vadd.f32 1.0, %v2581_v40 }
 0x99b   :  { %2582 = vrcp.f32 %v515_v41 }
 0x9a5   :  { %v2583_v42 = vpop.eup %2582 }
 0x9a6   :  { %v528_v48 = vsub.f32 1.0, %v2583_v42  ;;  %v536_v51 = vmul.f32 %v2583_v42, %v534_v49 }
 0x9fc   :  { %v519_v43 = vpop.permute.xlu0 %518 }
 0x9fd   :  { %v521_v44 = vmul.f32 %v2583_v42, %v519_v43 }
 0x9ff   :  { %523 = vrot.lane.b32.xlu1 %v521_v44, %s2843_s12 }
 0xa71   :  { %v524_v45 = vpop.permute.xlu1 %523 }
 0xa72   :  { %v526_v46 = vadd.f32 %v524_v45, %v3091_v21 }
 0xa74   :  { %2584 = vtanh.f32 %v526_v46 }
 0xa7e   :  { %v2585_v47 = vpop.eup %2584 }
 0xa7f   :  { %530 = vrot.lane.b32.xlu0 %v2585_v47, %s2852_s5 }
 0xaf1   :  { %v531_v50 = vpop.permute.xlu0 %530 }
 0xaf2   :  { %v533_v52 = vmul.f32 %v531_v50, %v528_v48 }
 0xaf4   :  { %v3154_v53 = vadd.f32 %v536_v51, %v533_v52 }
 0xaf6   :  { %v544_v54 = vpack.c.bf16 %v3154_v53, %v3154_v53  ;;  %v620_v17 = vrot.slane %v3154_v53, 7 }
 0xaf8   :  { %v546_v55 = vshrl.u32 %v544_v54, 16 }
 0xafa   :  { %v548_v56 = vrot.slane %v546_v55, 1 }
 0xafc   :  { %549 = vrot.lane.b32.xlu1 %v548_v56, %s2852_s5 }
 0xb6e   :  { %v550_v57 = vpop.permute.xlu1 %549 }
 0xb6f   :  { %2378 = vmatmul.mubr.msk.bf16.vlgmr.msra.gmra.mrb[8].mxu1 %vm216_vm3, %v550_v57 }
 0xb70   :  { %2390 = vmatpush3.bf16.msra.mxu1 %v3049_v1  ;;  %2393 = vmatprep.mubr.msk.bf16.mxu1 %vm2850_vm0, %v2849_v0 }
 0xb71   :  { %2391 = vmatprep.subr.bf16.mxu1 %v2849_v0 }
 0xb74   :  { %2392 = vmatpush3.bf16.msra.mxu1 %v3058_v4 }
 0xb75   :  { %2405 = vmatprep.subr.bf16.mxu1 %v2849_v0 }
 0xc42   :  { %v588_v58 = vpop.f32.mrb[8].mxu1 }
 0xc43   :  { %v589_v59 = vadd.f32 %v588_v58, %v3082_v10  ;;  %v2379_v61 = vpop.f32.mrb[9].mxu1 }
 0xc44   :  { %v591_v62 = vpop.f32.mrb[10].mxu1 }
 0xc45   :  { %v595_v63 = vrot.slane %v589_v59, 4  ;;  %v2380_v2 = vpop.f32.mrb[11].mxu1 }
 0xc47   :  { %604 = vrot.lane.b32.xlu0 %v595_v63, %s2843_s12  ;;  %v597_v3 = vadd.f32 %v595_v63, %v3091_v21 }
 0xc49   :  { %v2212_v5 = vmul.f32 -1.442695, %v597_v3 }
 0xc4b   :  { %2586 = vpow2.f32 %v2212_v5 }
 0xc55   :  { %v2587_v6 = vpop.eup %2586 }
 0xc56   :  { %v601_v7 = vadd.f32 1.0, %v2587_v6 }
 0xc58   :  { %2588 = vrcp.f32 %v601_v7 }
 0xc62   :  { %v2589_v8 = vpop.eup %2588 }
 0xc63   :  { %v614_v16 = vsub.f32 1.0, %v2589_v8  ;;  %v622_v19 = vmul.f32 %v2589_v8, %v620_v17 }
 0xcb9   :  { %v605_v9 = vpop.permute.xlu0 %604 }
 0xcba   :  { %v607_v11 = vmul.f32 %v2589_v8, %v605_v9 }
 0xcbc   :  { %609 = vrot.lane.b32.xlu1 %v607_v11, %s2843_s12 }
 0xd2e   :  { %v610_v12 = vpop.permute.xlu1 %609 }
 0xd2f   :  { %v612_v13 = vadd.f32 %v610_v12, %v3091_v21 }
 0xd31   :  { %2590 = vtanh.f32 %v612_v13 }
 0xd3b   :  { %v2591_v14 = vpop.eup %2590 }
 0xd3c   :  { %616 = vrot.lane.b32.xlu0 %v2591_v14, %s2852_s5 }
 0xdae   :  { %v617_v18 = vpop.permute.xlu0 %616 }
 0xdaf   :  { %v619_v20 = vmul.f32 %v617_v18, %v614_v16 }
 0xdb1   :  { %v3173_v22 = vadd.f32 %v622_v19, %v619_v20 }
 0xdb3   :  { %v630_v23 = vpack.c.bf16 %v3173_v22, %v3173_v22  ;;  %v704_v45 = vrot.slane %v3173_v22, 7 }
 0xdb5   :  { %v632_v24 = vrot.slane %v630_v23, 2 }
 0xdb7   :  { %633 = vrot.lane.b32.xlu1 %v632_v24, %s2852_s5 }
 0xe29   :  { %v634_v25 = vpop.permute.xlu1 %633 }
 0xe2a   :  { %2386 = vmatmul.mubr.msk.bf16.vlgmr.msra.gmra.mrb[12].mxu0 %vm216_vm3, %v634_v25 }
 0xe2b   :  { %2398 = vmatpush3.bf16.msra.mxu0 %v3049_v1  ;;  %2401 = vmatprep.mubr.msk.bf16.mxu0 %vm2850_vm0, %v2849_v0 }
 0xe2c   :  { %2399 = vmatprep.subr.bf16.mxu0 %v2849_v0 }
 0xe2f   :  { %2400 = vmatpush3.bf16.msra.mxu0 %v3058_v4 }
 0xe30   :  { %2413 = vmatprep.subr.bf16.mxu0 %v2849_v0 }
 0xefd   :  { %v672_v26 = vpop.f32.mrb[12].mxu0 }
 0xefe   :  { %v673_v28 = vadd.f32 %v672_v26, %v3082_v10  ;;  %v2387_v29 = vpop.f32.mrb[13].mxu0 }
 0xeff   :  { %v675_v30 = vpop.f32.mrb[14].mxu0 }
 0xf00   :  { %v679_v31 = vrot.slane %v673_v28, 3  ;;  %v2388_v32 = vpop.f32.mrb[15].mxu0 }
 0xf02   :  { %688 = vrot.lane.b32.xlu0 %v679_v31, %s2843_s12  ;;  %v681_v33 = vadd.f32 %v679_v31, %v3091_v21 }
 0xf04   :  { %v2214_v34 = vmul.f32 -1.442695, %v681_v33 }
 0xf06   :  { %2592 = vpow2.f32 %v2214_v34 }
 0xf10   :  { %v2593_v35 = vpop.eup %2592 }
 0xf11   :  { %v685_v37 = vadd.f32 1.0, %v2593_v35 }
 0xf13   :  { %2594 = vrcp.f32 %v685_v37 }
 0xf1d   :  { %v2595_v38 = vpop.eup %2594 }
 0xf1e   :  { %v698_v44 = vsub.f32 1.0, %v2595_v38  ;;  %v706_v47 = vmul.f32 %v2595_v38, %v704_v45 }
 0xf74   :  { %v689_v39 = vpop.permute.xlu0 %688 }
 0xf75   :  { %v691_v40 = vmul.f32 %v2595_v38, %v689_v39 }
 0xf77   :  { %693 = vrot.lane.b32.xlu1 %v691_v40, %s2843_s12 }
 0xfe9   :  { %v694_v41 = vpop.permute.xlu1 %693 }
 0xfea   :  { %v696_v42 = vadd.f32 %v694_v41, %v3091_v21 }
 0xfec   :  { %2596 = vtanh.f32 %v696_v42 }
 0xff6   :  { %v2597_v43 = vpop.eup %2596 }
 0xff7   :  { %700 = vrot.lane.b32.xlu0 %v2597_v43, %s2852_s5 }
0x1069   :  { %v701_v46 = vpop.permute.xlu0 %700 }
0x106a   :  { %v703_v48 = vmul.f32 %v701_v46, %v698_v44 }
0x106c   :  { %v3192_v49 = vadd.f32 %v706_v47, %v703_v48 }
0x106e   :  { %v714_v50 = vpack.c.bf16 %v3192_v49, %v3192_v49  ;;  %v790_v13 = vrot.slane %v3192_v49, 7 }
0x1070   :  { %v716_v51 = vshrl.u32 %v714_v50, 16 }
0x1072   :  { %v718_v52 = vrot.slane %v716_v51, 2 }
0x1074   :  { %719 = vrot.lane.b32.xlu1 %v718_v52, %s2852_s5 }
0x10e6   :  { %v720_v54 = vpop.permute.xlu1 %719 }
0x10e7   :  { %2394 = vmatmul.mubr.msk.bf16.vlgmr.msra.gmra.mrb[12].mxu1 %vm216_vm3, %v720_v54 }
0x10e8   :  { %2406 = vmatpush3.bf16.msra.mxu1 %v3049_v1  ;;  %2409 = vmatprep.mubr.msk.bf16.mxu1 %vm2850_vm0, %v2849_v0 }
0x10e9   :  { %2407 = vmatprep.subr.bf16.mxu1 %v2849_v0 }
0x10ec   :  { %2408 = vmatpush3.bf16.msra.mxu1 %v3058_v4 }
0x10ed   :  { %2421 = vmatprep.subr.bf16.mxu1 %v2849_v0 }
0x11ba   :  { %v758_v55 = vpop.f32.mrb[12].mxu1 }
0x11bb   :  { %v759_v56 = vadd.f32 %v758_v55, %v3082_v10  ;;  %v2395_v57 = vpop.f32.mrb[13].mxu1 }
0x11bc   :  { %v761_v58 = vpop.f32.mrb[14].mxu1 }
0x11bd   :  { %v765_v59 = vrot.slane %v759_v56, 2  ;;  %v2396_v61 = vpop.f32.mrb[15].mxu1 }
0x11bf   :  { %774 = vrot.lane.b32.xlu0 %v765_v59, %s2843_s12  ;;  %v767_v62 = vadd.f32 %v765_v59, %v3091_v21 }
0x11c1   :  { %v2216_v63 = vmul.f32 -1.442695, %v767_v62 }
0x11c3   :  { %2598 = vpow2.f32 %v2216_v63 }
0x11cd   :  { %v2599_v2 = vpop.eup %2598 }
0x11ce   :  { %v771_v3 = vadd.f32 1.0, %v2599_v2 }
0x11d0   :  { %2600 = vrcp.f32 %v771_v3 }
0x11da   :  { %v2601_v5 = vpop.eup %2600 }
0x11db   :  { %v784_v12 = vsub.f32 1.0, %v2601_v5  ;;  %v792_v16 = vmul.f32 %v2601_v5, %v790_v13 }
0x1231   :  { %v775_v6 = vpop.permute.xlu0 %774 }
0x1232   :  { %v777_v7 = vmul.f32 %v2601_v5, %v775_v6 }
0x1234   :  { %779 = vrot.lane.b32.xlu1 %v777_v7, %s2843_s12 }
0x12a6   :  { %v780_v8 = vpop.permute.xlu1 %779 }
0x12a7   :  { %v782_v9 = vadd.f32 %v780_v8, %v3091_v21 }
0x12a9   :  { %2602 = vtanh.f32 %v782_v9 }
0x12b3   :  { %v2603_v11 = vpop.eup %2602 }
0x12b4   :  { %786 = vrot.lane.b32.xlu0 %v2603_v11, %s2852_s5 }
0x1326   :  { %v787_v14 = vpop.permute.xlu0 %786 }
0x1327   :  { %v789_v17 = vmul.f32 %v787_v14, %v784_v12 }
0x1329   :  { %v3211_v18 = vadd.f32 %v792_v16, %v789_v17 }
0x132b   :  { %v800_v19 = vpack.c.bf16 %v3211_v18, %v3211_v18  ;;  %v874_v43 = vrot.slane %v3211_v18, 7 }
0x132d   :  { %v802_v20 = vrot.slane %v800_v19, 3 }
0x132f   :  { %803 = vrot.lane.b32.xlu1 %v802_v20, %s2852_s5 }
0x13a1   :  { %v804_v23 = vpop.permute.xlu1 %803 }
0x13a2   :  { %2402 = vmatmul.mubr.msk.bf16.vlgmr.msra.gmra.mrb[16].mxu0 %vm216_vm3, %v804_v23 }
0x13a3   :  { %2414 = vmatpush3.bf16.msra.mxu0 %v3049_v1  ;;  %2417 = vmatprep.mubr.msk.bf16.mxu0 %vm2850_vm0, %v2849_v0 }
0x13a4   :  { %2415 = vmatprep.subr.bf16.mxu0 %v2849_v0 }
0x13a7   :  { %2416 = vmatpush3.bf16.msra.mxu0 %v3058_v4 }
0x13a8   :  { %2429 = vmatprep.subr.bf16.mxu0 %v2849_v0 }
0x1475   :  { %v842_v24 = vpop.f32.mrb[16].mxu0 }
0x1476   :  { %v843_v25 = vadd.f32 %v842_v24, %v3082_v10  ;;  %v2403_v26 = vpop.f32.mrb[17].mxu0 }
0x1477   :  { %v845_v28 = vpop.f32.mrb[18].mxu0 }
0x1478   :  { %v849_v29 = vrot.slane %v843_v25, 1  ;;  %v2404_v30 = vpop.f32.mrb[19].mxu0 }
0x147a   :  { %858 = vrot.lane.b32.xlu0 %v849_v29, %s2843_s12  ;;  %v851_v31 = vadd.f32 %v849_v29, %v3091_v21 }
0x147c   :  { %v2218_v32 = vmul.f32 -1.442695, %v851_v31 }
0x147e   :  { %2604 = vpow2.f32 %v2218_v32 }
0x1488   :  { %v2605_v33 = vpop.eup %2604 }
0x1489   :  { %v855_v34 = vadd.f32 1.0, %v2605_v33 }
0x148b   :  { %2606 = vrcp.f32 %v855_v34 }
0x1495   :  { %v2607_v35 = vpop.eup %2606 }
0x1496   :  { %v868_v42 = vsub.f32 1.0, %v2607_v35  ;;  %v876_v45 = vmul.f32 %v2607_v35, %v874_v43 }
0x14ec   :  { %v859_v37 = vpop.permute.xlu0 %858 }
0x14ed   :  { %v861_v38 = vmul.f32 %v2607_v35, %v859_v37 }
0x14ef   :  { %863 = vrot.lane.b32.xlu1 %v861_v38, %s2843_s12 }
0x1561   :  { %v864_v39 = vpop.permute.xlu1 %863 }
0x1562   :  { %v866_v40 = vadd.f32 %v864_v39, %v3091_v21 }
0x1564   :  { %2608 = vtanh.f32 %v866_v40 }
0x156e   :  { %v2609_v41 = vpop.eup %2608 }
0x156f   :  { %870 = vrot.lane.b32.xlu0 %v2609_v41, %s2852_s5 }
0x15e1   :  { %v871_v44 = vpop.permute.xlu0 %870 }
0x15e2   :  { %v873_v46 = vmul.f32 %v871_v44, %v868_v42 }
0x15e4   :  { %v3230_v47 = vadd.f32 %v876_v45, %v873_v46 }
0x15e6   :  { %v884_v48 = vpack.c.bf16 %v3230_v47, %v3230_v47  ;;  %v958_v9 = vrot.slane %v3230_v47, 7 }
0x15e8   :  { %v886_v50 = vshrl.u32 %v884_v48, 16 }
0x15ea   :  { %v888_v51 = vrot.slane %v886_v50, 3 }
0x15ec   :  { %889 = vrot.lane.b32.xlu1 %v888_v51, %s2852_s5 }
0x165e   :  { %v890_v21 = vpop.permute.xlu1 %889 }
0x165f   :  { %2410 = vmatmul.mubr.msk.bf16.vlgmr.msra.gmra.mrb[16].mxu1 %vm216_vm3, %v890_v21 }
0x1660   :  { %2422 = vmatpush3.bf16.msra.mxu1 %v3049_v1  ;;  %2425 = vmatprep.mubr.msk.bf16.mxu1 %vm2850_vm0, %v2849_v0 }
0x1661   :  { %2423 = vmatprep.subr.bf16.mxu1 %v2849_v0 }
0x1664   :  { %2424 = vmatpush3.bf16.msra.mxu1 %v3058_v4 }
0x1665   :  { %2437 = vmatprep.subr.bf16.mxu1 %v2849_v0 }
0x1732   :  { %v928_v52 = vpop.f32.mrb[16].mxu1 }
0x1733   :  { %v929_v54 = vadd.f32 %v928_v52, %v3082_v10  ;;  %v2411_v55 = vpop.f32.mrb[17].mxu1 }
0x1734   :  { %v931_v56 = vpop.f32.mrb[18].mxu1 }
0x1735   :  { %942 = vrot.lane.b32.xlu0 %v929_v54, %s2843_s12  ;;  %v2412_v57 = vpop.f32.mrb[19].mxu1  ;;  %v934_v58 = vadd.f32 %v929_v54, %v3087_v15 }
0x1737   :  { %v2220_v59 = vmul.f32 -1.442695, %v934_v58 }
0x1739   :  { %2610 = vpow2.f32 %v2220_v59 }
0x1743   :  { %v2611_v61 = vpop.eup %2610 }
0x1744   :  { %v938_v62 = vadd.f32 1.0, %v2611_v61 }
0x1746   :  { %2612 = vrcp.f32 %v938_v62 }
0x1750   :  { %v2613_v63 = vpop.eup %2612 }
0x1751   :  { %v952_v8 = vsub.f32 1.0, %v2613_v63  ;;  %v960_v12 = vmul.f32 %v2613_v63, %v958_v9 }
0x17a7   :  { %v943_v2 = vpop.permute.xlu0 %942 }
0x17a8   :  { %v945_v3 = vmul.f32 %v2613_v63, %v943_v2 }
0x17aa   :  { %947 = vrot.lane.b32.xlu1 %v945_v3, %s2843_s12 }
0x181c   :  { %v948_v5 = vpop.permute.xlu1 %947 }
0x181d   :  { %v950_v6 = vadd.f32 %v948_v5, %v3087_v15 }
0x181f   :  { %2614 = vtanh.f32 %v950_v6 }
0x1829   :  { %v2615_v7 = vpop.eup %2614 }
0x182a   :  { %954 = vrot.lane.b32.xlu0 %v2615_v7, %s2852_s5 }
0x189c   :  { %v955_v11 = vpop.permute.xlu0 %954 }
0x189d   :  { %v957_v13 = vmul.f32 %v955_v11, %v952_v8 }
0x189f   :  { %v3249_v14 = vadd.f32 %v960_v12, %v957_v13 }
0x18a1   :  { %v967_v16 = vpack.c.bf16 %v3249_v14, %v3249_v14  ;;  %v1040_v40 = vrot.slane %v3249_v14, 7 }
0x18a3   :  { %969 = vrot.lane.b32.xlu1 %v967_v16, %s2852_s5 }
0x1915   :  { %v970_v17 = vpop.permute.xlu1 %969 }
0x1916   :  { %2418 = vmatmul.mubr.msk.bf16.vlgmr.msra.gmra.mrb[20].mxu0 %vm216_vm3, %v970_v17 }
0x1917   :  { %2430 = vmatpush3.bf16.msra.mxu0 %v3049_v1  ;;  %2433 = vmatprep.mubr.msk.bf16.mxu0 %vm2850_vm0, %v2849_v0 }
0x1918   :  { %2431 = vmatprep.subr.bf16.mxu0 %v2849_v0 }
0x191b   :  { %2432 = vmatpush3.bf16.msra.mxu0 %v3058_v4 }
0x191c   :  { %2445 = vmatprep.subr.bf16.mxu0 %v2849_v0 }
0x19e9   :  { %v1008_v19 = vpop.f32.mrb[20].mxu0 }
0x19ea   :  { %v1009_v20 = vadd.f32 %v1008_v19, %v3082_v10  ;;  %v2419_v23 = vpop.f32.mrb[21].mxu0 }
0x19eb   :  { %v1011_v24 = vpop.f32.mrb[22].mxu0 }
0x19ec   :  { %v1015_v25 = vrot.slane %v1009_v20, 7  ;;  %v2420_v26 = vpop.f32.mrb[23].mxu0 }
0x19ee   :  { %1024 = vrot.lane.b32.xlu0 %v1015_v25, %s2843_s12  ;;  %v1017_v28 = vadd.f32 %v1015_v25, %v3087_v15 }
0x19f0   :  { %v2222_v29 = vmul.f32 -1.442695, %v1017_v28 }
0x19f2   :  { %2616 = vpow2.f32 %v2222_v29 }
0x19fc   :  { %v2617_v30 = vpop.eup %2616 }
0x19fd   :  { %v1021_v31 = vadd.f32 1.0, %v2617_v30 }
0x19ff   :  { %2618 = vrcp.f32 %v1021_v31 }
0x1a09   :  { %v2619_v32 = vpop.eup %2618 }
0x1a0a   :  { %v1034_v39 = vsub.f32 1.0, %v2619_v32  ;;  %v1042_v42 = vmul.f32 %v2619_v32, %v1040_v40 }
0x1a60   :  { %v1025_v33 = vpop.permute.xlu0 %1024 }
0x1a61   :  { %v1027_v34 = vmul.f32 %v2619_v32, %v1025_v33 }
0x1a63   :  { %1029 = vrot.lane.b32.xlu1 %v1027_v34, %s2843_s12 }
0x1ad5   :  { %v1030_v35 = vpop.permute.xlu1 %1029 }
0x1ad6   :  { %v1032_v37 = vadd.f32 %v1030_v35, %v3087_v15 }
0x1ad8   :  { %2620 = vtanh.f32 %v1032_v37 }
0x1ae2   :  { %v2621_v38 = vpop.eup %2620 }
0x1ae3   :  { %1036 = vrot.lane.b32.xlu0 %v2621_v38, %s2852_s5 }
0x1b55   :  { %v1037_v41 = vpop.permute.xlu0 %1036 }
0x1b56   :  { %v1039_v43 = vmul.f32 %v1037_v41, %v1034_v39 }
0x1b58   :  { %v3268_v44 = vadd.f32 %v1042_v42, %v1039_v43 }
0x1b5a   :  { %v1049_v45 = vpack.c.bf16 %v3268_v44, %v3268_v44  ;;  %v1124_v7 = vrot.slane %v3268_v44, 7 }
0x1b5c   :  { %v1051_v46 = vshrl.u32 %v1049_v45, 16 }
0x1b5e   :  { %1053 = vrot.lane.b32.xlu1 %v1051_v46, %s2852_s5 }
0x1bd0   :  { %v1054_v48 = vpop.permute.xlu1 %1053 }
0x1bd1   :  { %2426 = vmatmul.mubr.msk.bf16.vlgmr.msra.gmra.mrb[20].mxu1 %vm216_vm3, %v1054_v48 }
0x1bd2   :  { %2438 = vmatpush3.bf16.msra.mxu1 %v3049_v1  ;;  %2441 = vmatprep.mubr.msk.bf16.mxu1 %vm2850_vm0, %v2849_v0 }
0x1bd3   :  { %2439 = vmatprep.subr.bf16.mxu1 %v2849_v0 }
0x1bd6   :  { %2440 = vmatpush3.bf16.msra.mxu1 %v3058_v4 }
0x1bd7   :  { %2453 = vmatprep.subr.bf16.mxu1 %v2849_v0 }
0x1ca4   :  { %v1092_v50 = vpop.f32.mrb[20].mxu1 }
0x1ca5   :  { %v1093_v51 = vadd.f32 %v1092_v50, %v3082_v10  ;;  %v2427_v21 = vpop.f32.mrb[21].mxu1 }
0x1ca6   :  { %v1095_v52 = vpop.f32.mrb[22].mxu1 }
0x1ca7   :  { %v1099_v54 = vrot.slane %v1093_v51, 6  ;;  %v2428_v55 = vpop.f32.mrb[23].mxu1  ;;  %v2674_v51 = vld [vmem:[%s3578_s23] sm:$0xff]  }
0x1ca9   :  { %1108 = vrot.lane.b32.xlu0 %v1099_v54, %s2843_s12  ;;  %v1101_v56 = vadd.f32 %v1099_v54, %v3087_v15 }
0x1cab   :  { %v2224_v57 = vmul.f32 -1.442695, %v1101_v56 }
0x1cad   :  { %2622 = vpow2.f32 %v2224_v57 }
0x1cb7   :  { %v2623_v58 = vpop.eup %2622 }
0x1cb8   :  { %v1105_v59 = vadd.f32 1.0, %v2623_v58 }
0x1cba   :  { %2624 = vrcp.f32 %v1105_v59 }
0x1cc4   :  { %v2625_v61 = vpop.eup %2624 }
0x1cc5   :  { %v1118_v6 = vsub.f32 1.0, %v2625_v61  ;;  %v1126_v9 = vmul.f32 %v2625_v61, %v1124_v7 }
0x1d1b   :  { %v1109_v62 = vpop.permute.xlu0 %1108 }
0x1d1c   :  { %v1111_v63 = vmul.f32 %v2625_v61, %v1109_v62 }
0x1d1e   :  { %1113 = vrot.lane.b32.xlu1 %v1111_v63, %s2843_s12 }
0x1d90   :  { %v1114_v2 = vpop.permute.xlu1 %1113 }
0x1d91   :  { %v1116_v3 = vadd.f32 %v1114_v2, %v3087_v15 }
0x1d93   :  { %2626 = vtanh.f32 %v1116_v3 }
0x1d9d   :  { %v2627_v5 = vpop.eup %2626 }
0x1d9e   :  { %1120 = vrot.lane.b32.xlu0 %v2627_v5, %s2852_s5 }
0x1e10   :  { %v1121_v8 = vpop.permute.xlu0 %1120 }
0x1e11   :  { %v1123_v11 = vmul.f32 %v1121_v8, %v1118_v6 }
0x1e13   :  { %v3287_v12 = vadd.f32 %v1126_v9, %v1123_v11 }
0x1e15   :  { %v1133_v13 = vpack.c.bf16 %v3287_v12, %v3287_v12  ;;  %v1207_v39 = vrot.slane %v3287_v12, 7 }
0x1e17   :  { %v1135_v16 = vrot.slane %v1133_v13, 1 }
0x1e19   :  { %1136 = vrot.lane.b32.xlu1 %v1135_v16, %s2852_s5 }
0x1e8b   :  { %v1137_v17 = vpop.permute.xlu1 %1136 }
0x1e8c   :  { %2434 = vmatmul.mubr.msk.bf16.vlgmr.msra.gmra.mrb[24].mxu0 %vm216_vm3, %v1137_v17 }
0x1e8d   :  { %2446 = vmatpush3.bf16.msra.mxu0 %v3049_v1  ;;  %2449 = vmatprep.mubr.msk.bf16.mxu0 %vm2850_vm0, %v2849_v0 }
0x1e8e   :  { %2447 = vmatprep.subr.bf16.mxu0 %v2849_v0 }
0x1e91   :  { %2448 = vmatpush3.bf16.msra.mxu0 %v3058_v4 }
0x1e92   :  { %2461 = vmatprep.subr.bf16.mxu0 %v2849_v0 }
0x1f5f   :  { %v1175_v19 = vpop.f32.mrb[24].mxu0 }
0x1f60   :  { %v1176_v20 = vadd.f32 %v1175_v19, %v3082_v10  ;;  %v2435_v23 = vpop.f32.mrb[25].mxu0 }
0x1f61   :  { %v1178_v24 = vpop.f32.mrb[26].mxu0  ;;  %v2675_v23 = vld [vmem:[%s3578_s23 + $0x8] sm:$0xff]  }
0x1f62   :  { %v1182_v25 = vrot.slane %v1176_v20, 5  ;;  %v2436_v26 = vpop.f32.mrb[27].mxu0 }
0x1f64   :  { %1191 = vrot.lane.b32.xlu0 %v1182_v25, %s2843_s12  ;;  %v1184_v1 = vadd.f32 %v1182_v25, %v3087_v15 }
0x1f66   :  { %v2226_v28 = vmul.f32 -1.442695, %v1184_v1 }
0x1f68   :  { %2628 = vpow2.f32 %v2226_v28 }
0x1f72   :  { %v2629_v29 = vpop.eup %2628 }
0x1f73   :  { %v1188_v30 = vadd.f32 1.0, %v2629_v29 }
0x1f75   :  { %2630 = vrcp.f32 %v1188_v30 }
0x1f7f   :  { %v2631_v31 = vpop.eup %2630 }
0x1f80   :  { %v1201_v38 = vsub.f32 1.0, %v2631_v31  ;;  %v1209_v41 = vmul.f32 %v2631_v31, %v1207_v39 }
0x1fd6   :  { %v1192_v32 = vpop.permute.xlu0 %1191 }
0x1fd7   :  { %v1194_v33 = vmul.f32 %v2631_v31, %v1192_v32 }
0x1fd9   :  { %1196 = vrot.lane.b32.xlu1 %v1194_v33, %s2843_s12 }
0x204b   :  { %v1197_v34 = vpop.permute.xlu1 %1196 }
0x204c   :  { %v1199_v35 = vadd.f32 %v1197_v34, %v3087_v15 }
0x204e   :  { %2632 = vtanh.f32 %v1199_v35 }
0x2058   :  { %v2633_v37 = vpop.eup %2632 }
0x2059   :  { %1203 = vrot.lane.b32.xlu0 %v2633_v37, %s2852_s5 }
0x20cb   :  { %v1204_v40 = vpop.permute.xlu0 %1203 }
0x20cc   :  { %v1206_v42 = vmul.f32 %v1204_v40, %v1201_v38 }
0x20ce   :  { %v3306_v43 = vadd.f32 %v1209_v41, %v1206_v42 }
0x20d0   :  { %v1216_v45 = vpack.c.bf16 %v3306_v43, %v3306_v43  ;;  %v1292_v8 = vrot.slane %v3306_v43, 7 }
0x20d2   :  { %v1218_v46 = vshrl.u32 %v1216_v45, 16 }
0x20d4   :  { %v1220_v48 = vrot.slane %v1218_v46, 1 }
0x20d6   :  { %1221 = vrot.lane.b32.xlu1 %v1220_v48, %s2852_s5 }
0x2148   :  { %v1222_v50 = vpop.permute.xlu1 %1221 }
0x2149   :  { %2442 = vmatmul.mubr.msk.bf16.vlgmr.msra.gmra.mrb[24].mxu1 %vm216_vm3, %v1222_v50 }
0x214a   :  { %2454 = vmatpush3.bf16.msra.mxu1 %v2674_v51  ;;  %2457 = vmatprep.mubr.msk.bf16.mxu1 %vm2850_vm0, %v2849_v0 }
0x214b   :  { %2455 = vmatprep.subr.bf16.mxu1 %v2849_v0 }
0x214e   :  { %2456 = vmatpush3.bf16.msra.mxu1 %v3058_v4 }
0x214f   :  { %2469 = vmatprep.subr.bf16.mxu1 %v2849_v0 }
0x221c   :  { %v1260_v21 = vpop.f32.mrb[24].mxu1 }
0x221d   :  { %v1261_v52 = vadd.f32 %v1260_v21, %v3082_v10  ;;  %v2443_v54 = vpop.f32.mrb[25].mxu1 }
0x221e   :  { %v1263_v55 = vpop.f32.mrb[26].mxu1 }
0x221f   :  { %v1267_v56 = vrot.slane %v1261_v52, 4  ;;  %v2444_v57 = vpop.f32.mrb[27].mxu1  ;;  %v2676_v55 = vld [vmem:[#allocation3] sm:$0x1] }
0x2221   :  { %1276 = vrot.lane.b32.xlu0 %v1267_v56, %s2843_s12  ;;  %v1269_v58 = vadd.f32 %v1267_v56, %v3087_v15 }
0x2223   :  { %v2228_v59 = vmul.f32 -1.442695, %v1269_v58 }
0x2225   :  { %2634 = vpow2.f32 %v2228_v59 }
0x222f   :  { %v2635_v61 = vpop.eup %2634 }
0x2230   :  { %v1273_v62 = vadd.f32 1.0, %v2635_v61 }
0x2232   :  { %2636 = vrcp.f32 %v1273_v62 }
0x223c   :  { %v2637_v63 = vpop.eup %2636 }
0x223d   :  { %v1286_v7 = vsub.f32 1.0, %v2637_v63  ;;  %v1294_v11 = vmul.f32 %v2637_v63, %v1292_v8  ;;  %v1556_v8 = vld [vmem:[%s3581_s22 + $0x8] sm:$0xff] }
0x2293   :  { %v1277_v4 = vpop.permute.xlu0 %1276 }
0x2294   :  { %v1279_v2 = vmul.f32 %v2637_v63, %v1277_v4 }
0x2296   :  { %1281 = vrot.lane.b32.xlu1 %v1279_v2, %s2843_s12 }
0x2308   :  { %v1282_v3 = vpop.permute.xlu1 %1281 }
0x2309   :  { %v1284_v5 = vadd.f32 %v1282_v3, %v3087_v15 }
0x230b   :  { %2638 = vtanh.f32 %v1284_v5 }
0x2315   :  { %v2639_v6 = vpop.eup %2638 }
0x2316   :  { %1288 = vrot.lane.b32.xlu0 %v2639_v6, %s2852_s5 }
0x2388   :  { %v1289_v9 = vpop.permute.xlu0 %1288 }
0x2389   :  { %v1291_v13 = vmul.f32 %v1289_v9, %v1286_v7  ;;  %v1555_v7 = vld [vmem:[%s3581_s22] sm:$0xff] }
0x238a   :  { %v1552_v9 = vld [vmem:[%s3582_s1] sm:$0xff] }
0x238b   :  { %v3327_v16 = vadd.f32 %v1294_v11, %v1291_v13  ;;  %v1557_v11 = vpack.c.bf16 %v1556_v8, %v1555_v7  ;;  %v1553_v13 = vld [vmem:[%s3582_s1 + $0x8] sm:$0xff]  ;;  %v2550_v7 = vld [vmem:[%s3556_s8] sm:$0xff]  }
0x238c   :  { %v2551_v8 = vld [vmem:[%s3556_s8 + $0x8] sm:$0xff]  }
0x238d   :  { %v1301_v17 = vpack.c.bf16 %v3327_v16, %v3327_v16  ;;  %v1375_v41 = vrot.slane %v3327_v16, 7 }
0x238f   :  { %v1303_v19 = vrot.slane %v1301_v17, 2  ;;  %v1554_v17 = vpack.c.bf16 %v1553_v13, %v1552_v9 }
0x2391   :  { %1304 = vrot.lane.b32.xlu1 %v1303_v19, %s2852_s5 }
0x2403   :  { %v1305_v20 = vpop.permute.xlu1 %1304 }
0x2404   :  { %2450 = vmatmul.mubr.msk.bf16.vlgmr.msra.gmra.mrb[28].mxu0 %vm216_vm3, %v1305_v20 }
0x2405   :  { %2462 = vmatpush3.bf16.msra.mxu0 %v2674_v51  ;;  %2465 = vmatprep.mubr.msk.bf16.mxu0 %vm2850_vm0, %v2849_v0 }
0x2406   :  { %2463 = vmatprep.subr.bf16.mxu0 %v2849_v0 }
0x2409   :  { %2464 = vmatpush3.bf16.msra.mxu0 %v2675_v23 }
0x240a   :  { %2475 = vmatprep.subr.bf16.mxu0 %v2849_v0 }
0x24d7   :  { %v1343_v24 = vpop.f32.mrb[28].mxu0 }
0x24d8   :  { %v1344_v25 = vadd.f32 %v1343_v24, %v3082_v10  ;;  %v2451_v26 = vpop.f32.mrb[29].mxu0 }
0x24d9   :  { %v1346_v1 = vpop.f32.mrb[30].mxu0 }
0x24da   :  { %v1350_v28 = vrot.slane %v1344_v25, 3  ;;  %v2452_v29 = vpop.f32.mrb[31].mxu0 }
0x24dc   :  { %1359 = vrot.lane.b32.xlu0 %v1350_v28, %s2843_s12  ;;  %v1352_v30 = vadd.f32 %v1350_v28, %v3087_v15 }
0x24de   :  { %v2230_v31 = vmul.f32 -1.442695, %v1352_v30 }
0x24e0   :  { %2640 = vpow2.f32 %v2230_v31 }
0x24ea   :  { %v2641_v32 = vpop.eup %2640 }
0x24eb   :  { %v1356_v33 = vadd.f32 1.0, %v2641_v32 }
0x24ed   :  { %2642 = vrcp.f32 %v1356_v33 }
0x24f7   :  { %v2643_v34 = vpop.eup %2642 }
0x24f8   :  { %v1369_v40 = vsub.f32 1.0, %v2643_v34  ;;  %v1377_v45 = vmul.f32 %v2643_v34, %v1375_v41 }
0x254e   :  { %v1360_v35 = vpop.permute.xlu0 %1359 }
0x254f   :  { %v1362_v37 = vmul.f32 %v2643_v34, %v1360_v35 }
0x2551   :  { %1364 = vrot.lane.b32.xlu1 %v1362_v37, %s2843_s12 }
0x25c3   :  { %v1365_v38 = vpop.permute.xlu1 %1364 }
0x25c4   :  { %v1367_v10 = vadd.f32 %v1365_v38, %v3087_v15  ;;  %v1604_v38 = vld [vmem:[%s3555_s7] sm:$0x3] }
0x25c6   :  { %2644 = vtanh.f32 %v1367_v10  ;;  %v1616_v10 = vsel %vm1614_vm5, %v1604_v38, 0 }
0x25d0   :  { %v2645_v39 = vpop.eup %2644 }
0x25d1   :  { %1371 = vrot.lane.b32.xlu0 %v2645_v39, %s2852_s5 }
0x2643   :  { %v1372_v42 = vpop.permute.xlu0 %1371 }
0x2644   :  { %v1374_v46 = vmul.f32 %v1372_v42, %v1369_v40 }
0x2646   :  { %v3347_v48 = vadd.f32 %v1377_v45, %v1374_v46 }
0x2648   :  { %v1384_v50 = vpack.c.bf16 %v3347_v48, %v3347_v48  ;;  %v1460_v28 = vrot.slane %v3347_v48, 7 }
0x264a   :  { %v1386_v51 = vshrl.u32 %v1384_v50, 16 }
0x264c   :  { %v1388_v21 = vrot.slane %v1386_v51, 2  ;;  %v2236_v51 = vld [vmem:[%s3557_s9] ss:$0 sm:$0xff] }
0x264e   :  { %1389 = vrot.lane.b32.xlu1 %v1388_v21, %s2852_s5 }
0x26c0   :  { %v1390_v52 = vpop.permute.xlu1 %1389 }
0x26c1   :  { %2458 = vmatmul.mubr.msk.bf16.vlgmr.msra.gmra.mrb[28].mxu1 %vm216_vm3, %v1390_v52 }
0x26c2   :  { %2471 = vmatprep.mubr.msk.bf16.mxu1 %vm2850_vm0, %v2849_v0  ;;  %2470 = vmatpush3.bf16.msra.mxu1 %v1557_v11 }
0x26c3   :  { %2481 = vmatprep.subr.bf16.mxu1 %v2849_v0 }
0x26c9   :  { %2472 = vmatmul.mubr.msk.bf16.vlgmr.msra.gmra.mrb[32].mxu1 %vm1558_vm4, %v1554_v17 }
0x26ca   :  { %2483 = vmatprep.mubr.msk.bf16.mxu1 %vm2850_vm0, %v2849_v0 }
0x2794   :  { %v1428_v54 = vpop.f32.mrb[28].mxu1 }
0x2795   :  { %v1429_v56 = vadd.f32 %v2676_v55, %v1428_v54  ;;  %v2459_v57 = vpop.f32.mrb[29].mxu1 }
0x2796   :  { %v1431_v58 = vpop.f32.mrb[30].mxu1 }
0x2797   :  { %v1435_v59 = vrot.slane %v1429_v56, 2  ;;  %v2460_v61 = vpop.f32.mrb[31].mxu1 }
0x2799   :  { %1444 = vrot.lane.b32.xlu0 %v1435_v59, %s2843_s12  ;;  %v1437_v62 = vadd.f32 %v1435_v59, %v3087_v15 }
0x279b   :  { %v2232_v63 = vmul.f32 -1.442695, %v1437_v62 }
0x279c   :  { %v1596_v24 = vpop.f32.mrb[32].mxu1 }
0x279d   :  { %2646 = vpow2.f32 %v2232_v63  ;;  %v2473_v25 = vpop.f32.mrb[33].mxu1 }
0x279e   :  { %v1599_v26 = vpop.f32.mrb[34].mxu1 }
0x279f   :  { %v1603_v29 = vpack.c.bf16 %v1599_v26, %v1596_v24  ;;  %v2474_v30 = vpop.f32.mrb[35].mxu1 }
0x27a7   :  { %v2647_v4 = vpop.eup %2646 }
0x27a8   :  { %v1441_v2 = vadd.f32 1.0, %v2647_v4 }
0x27aa   :  { %2648 = vrcp.f32 %v1441_v2 }
0x27b4   :  { %v2649_v3 = vpop.eup %2648 }
0x27b5   :  { %v1454_v1 = vsub.f32 1.0, %v2649_v3  ;;  %v1462_v32 = vmul.f32 %v2649_v3, %v1460_v28 }
0x280b   :  { %v1445_v5 = vpop.permute.xlu0 %1444 }
0x280c   :  { %v1447_v6 = vmul.f32 %v2649_v3, %v1445_v5 }
0x280e   :  { %1449 = vrot.lane.b32.xlu1 %v1447_v6, %s2843_s12 }
0x2880   :  { %v1450_v19 = vpop.permute.xlu1 %1449 }
0x2881   :  { %v1452_v20 = vadd.f32 %v1450_v19, %v3087_v15 }
0x2883   :  { %2650 = vtanh.f32 %v1452_v20 }
0x288d   :  { %v2651_v23 = vpop.eup %2650 }
0x288e   :  { %1456 = vrot.lane.b32.xlu0 %v2651_v23, %s2852_s5 }
0x2900   :  { %v1457_v31 = vpop.permute.xlu0 %1456 }
0x2901   :  { %v1459_v33 = vmul.f32 %v1457_v31, %v1454_v1 }
0x2903   :  { %v3377_v34 = vadd.f32 %v1462_v32, %v1459_v33 }
0x2905   :  { %v1469_v35 = vpack.c.bf16 %v3377_v34, %v3377_v34 }
0x2907   :  { %v1471_v37 = vrot.slane %v1469_v35, 3  ;;  %v2239_v35 = vld [vmem:[%s3557_s9 + $0x1] ss:$0 sm:$0xff] }
0x2909   :  { %1472 = vrot.lane.b32.xlu1 %v1471_v37, %s2852_s5 }
0x297b   :  { %v1473_v39 = vpop.permute.xlu1 %1472 }
0x297c   :  { %2466 = vmatmul.mubr.msk.bf16.vlgmr.msra.gmra.mrb[32].mxu0 %vm216_vm3, %v1473_v39 }
0x297d   :  { %2476 = vmatpush3.bf16.msra.mxu0 %v1616_v10  ;;  %2477 = vmatprep.mubr.msk.bf16.mxu0 %vm2850_vm0, %v2849_v0 }
0x297e   :  { %2487 = vmatprep.subr.bf16.mxu0 %v2849_v0 }
0x2984   :  { %2478 = vmatmul.mubr.msk.bf16.vlgmr.msra.gmra.mrb[36].mxu0 %vm1610_vm6, %v1603_v29 }
0x2985   :  { %2491 = vmatprep.mubr.msk.bf16.mxu0 %vm2850_vm0, %v2849_v0  ;;  %2488 = vmatpush3.bf16.msra.mxu0 %v2550_v7 }
0x2986   :  { %2489 = vmatprep.subr.bf16.mxu0 %v2849_v0 }
0x2989   :  { %2490 = vmatpush3.bf16.msra.mxu0 %v2551_v8 }
0x298a   :  { %2503 = vmatprep.subr.bf16.mxu0 %v2849_v0 }
0x2a4f   :  { %v1511_v40 = vpop.f32.mrb[32].mxu0 }
0x2a50   :  { %v1512_v41 = vadd.f32 %v2676_v55, %v1511_v40  ;;  %v2467_v42 = vpop.f32.mrb[33].mxu0 }
0x2a51   :  { %v1514_v45 = vpop.f32.mrb[34].mxu0 }
0x2a52   :  { %v1518_v46 = vrot.slane %v1512_v41, 1  ;;  %v2468_v50 = vpop.f32.mrb[35].mxu0 }
0x2a54   :  { %1527 = vrot.lane.b32.xlu0 %v1518_v46, %s2843_s12  ;;  %v1520_v55 = vadd.f32 %v1518_v46, %v3087_v15 }
0x2a56   :  { %v2234_v63 = vmul.f32 -1.442695, %v1520_v55 }
0x2a57   :  { %v1652_v21 = vpop.f32.mrb[36].mxu0 }
0x2a58   :  { %v1653_v52 = vadd.f32 %v2236_v51, %v1652_v21  ;;  %v2479_v54 = vpop.f32.mrb[37].mxu0  ;;  %2652 = vpow2.f32 %v2234_v63 }
0x2a59   :  { %v1655_v56 = vpop.f32.mrb[38].mxu0 }
0x2a5a   :  { %v1659_v57 = vmax.f32 %v1653_v52, 0.0  ;;  %v1656_v58 = vadd.f32 %v2236_v51, %v1655_v56  ;;  %v2480_v59 = vpop.f32.mrb[39].mxu0 }
0x2a5c   :  { %v1660_v61 = vmax.f32 %v1656_v58, 0.0  ;;  %v2249_v58 = vld [vmem:[#allocation6] ss:$0 sm:$0xff] }
0x2a5e   :  { %v1661_v62 = vpack.c.bf16 %v1660_v61, %v1659_v57 }
0x2a60   :  { %2482 = vmatpush3.bf16.msra.mxu1 %v1661_v62 }
0x2a61   :  { %2495 = vmatprep.subr.bf16.mxu1 %v2849_v0 }
0x2a62   :  { %v2653_v4 = vpop.eup %2652 }
0x2a63   :  { %2484 = vmatmul.mubr.msk.bf16.vlgmr.msra.gmra.mrb[36].mxu1 %vm1558_vm4, %v1554_v17  ;;  %v1524_v2 = vadd.f32 1.0, %v2653_v4 }
0x2a64   :  { %2499 = vmatprep.mubr.msk.bf16.mxu1 %vm2850_vm0, %v2849_v0 }
0x2a65   :  { %2654 = vrcp.f32 %v1524_v2 }
0x2a6f   :  { %v3400_v3 = vpop.eup %2654 }
0x2ac6   :  { %v1528_v5 = vpop.permute.xlu0 %1527 }
0x2ac7   :  { %v1530_v6 = vmul.f32 %v3400_v3, %v1528_v5 }
0x2ac9   :  { %1532 = vrot.lane.b32.xlu1 %v1530_v6, %s2843_s12 }
0x2acd   :  { %287 = vrot.lane.b32.xlu1 %v3097_v36, %s2852_s5 }
0x2ad1   :  { %455 = vrot.lane.b32.xlu1 %v3135_v27, %s2852_s5 }
0x2ad5   :  { %625 = vrot.lane.b32.xlu1 %v3173_v22, %s2852_s5 }
0x2ad9   :  { %795 = vrot.lane.b32.xlu1 %v3211_v18, %s2852_s5 }
0x2add   :  { %963 = vrot.lane.b32.xlu1 %v3249_v14, %s2852_s5 }
0x2ae1   :  { %1129 = vrot.lane.b32.xlu1 %v3287_v12, %s2852_s5 }
0x2ae5   :  { %1297 = vrot.lane.b32.xlu1 %v3327_v16, %s2852_s5 }
0x2ae9   :  { %1465 = vrot.lane.b32.xlu1 %v3377_v34, %s2852_s5 }
0x2b36   :  { %v1696_v36 = vpop.f32.mrb[36].mxu1 }
0x2b37   :  { %v2485_v27 = vpop.f32.mrb[37].mxu1 }
0x2b38   :  { %v1699_v22 = vpop.f32.mrb[38].mxu1 }
0x2b39   :  { %v1703_v9 = vpack.c.bf16 %v1699_v22, %v1696_v36  ;;  %v2486_v18 = vpop.f32.mrb[39].mxu1  ;;  %v2556_v22 = vld [vmem:[#allocation9] sm:$0xff]  }
0x2b3a   :  { %v2558_v18 = vld [vmem:[#allocation9 + $0x8] sm:$0xff]  }
0x2b3b   :  { %v1533_v11 = vpop.permute.xlu1 %1532  ;;  %2492 = vmatmul.mubr.msk.bf16.vlgmr.msra.gmra.mrb[40].mxu0 %vm216_vm3, %v1703_v9  ;;  %v2557_v9 = vld [vmem:[%s3562_s14] sm:$0xff]  }
0x2b3c   :  { %v1535_v13 = vadd.f32 %v1533_v11, %v3087_v15  ;;  %2507 = vmatprep.mubr.msk.bf16.mxu0 %vm2850_vm0, %v2849_v0  ;;  %v2559_v11 = vld [vmem:[%s3562_s14 + $0x8] sm:$0xff]  }
0x2b3e   :  { %2656 = vtanh.f32 %v1535_v13  ;;  %v2096_v13 = vlaneseq }
0x2b3f   :  { %v288_v14 = vpop.permute.xlu1 %287 }
0x2b40   :  { %291 = vst.msk [vmem:[#allocation2] sm:$0x1] %vm290_vm7, %v288_v14  ;;  %v2097_v14 = vshrl.u32 %v2096_v13, 7 }
0x2b43   :  { %v456_v12 = vpop.permute.xlu1 %455 }
0x2b44   :  { %459 = vst.msk [vmem:[#allocation2] sm:$0x4] %vm458_vm8, %v456_v12  ;;  %v3505_v12 = vld [vmem:[#allocation12] sm:$0x1] }
0x2b47   :  { %v626_v16 = vpop.permute.xlu1 %625 }
0x2b48   :  { %v2657_v17 = vpop.eup %2656  ;;  %629 = vst.msk [vmem:[#allocation2] sm:$0x10] %vm628_vm9, %v626_v16  ;;  %v2098_v16 = vsub.s32 0, %v2097_v14 }
0x2b49   :  { %1539 = vrot.lane.b32.xlu0 %v2657_v17, %s2852_s5 }
0x2b4a   :  { %v2099_v17 = vrot.slane %v3505_v12, %v2098_v16 }
0x2b4b   :  { %v796_v15 = vpop.permute.xlu1 %795 }
0x2b4c   :  { %799 = vst.msk [vmem:[#allocation2] sm:$0x40] %vm798_vm10, %v796_v15 }
0x2b4d   :  { %370 = vrot.lane.b32.xlu0 %v3116_v60, %s2852_s5  ;;  %v2552_v60 = vld [vmem:[%s3559_s11] sm:$0xff]  }
0x2b4e   :  { %2496 = vmatpush3.bf16.msra.mxu1 %v2552_v60 }
0x2b4f   :  { %v964_v19 = vpop.permute.xlu1 %963  ;;  %2497 = vmatprep.subr.bf16.mxu1 %v2849_v0 }
0x2b50   :  { %966 = vst.msk [vmem:[#allocation2 + $0x8] sm:$0x1] %vm290_vm7, %v964_v19 }
0x2b51   :  { %539 = vrot.lane.b32.xlu0 %v3154_v53, %s2852_s5  ;;  %v2553_v53 = vld [vmem:[%s3559_s11 + $0x8] sm:$0xff]  }
0x2b52   :  { %2498 = vmatpush3.bf16.msra.mxu1 %v2553_v53 }
0x2b53   :  { %v1130_v20 = vpop.permute.xlu1 %1129  ;;  %2511 = vmatprep.subr.bf16.mxu1 %v2849_v0 }
0x2b54   :  { %1132 = vst.msk [vmem:[#allocation2 + $0x8] sm:$0x4] %vm458_vm8, %v1130_v20 }
0x2b55   :  { %709 = vrot.lane.b32.xlu0 %v3192_v49, %s2852_s5  ;;  %v2554_v49 = vld [vmem:[%s3558_s10] sm:$0xff]  }
0x2b56   :  { %2504 = vmatpush3.bf16.msra.mxu0 %v2554_v49 }
0x2b57   :  { %v1298_v23 = vpop.permute.xlu1 %1297  ;;  %2505 = vmatprep.subr.bf16.mxu0 %v2849_v0 }
0x2b58   :  { %1300 = vst.msk [vmem:[#allocation2 + $0x8] sm:$0x10] %vm628_vm9, %v1298_v23 }
0x2b59   :  { %879 = vrot.lane.b32.xlu0 %v3230_v47, %s2852_s5  ;;  %v2555_v47 = vld [vmem:[%s3558_s10 + $0x8] sm:$0xff]  }
0x2b5a   :  { %2506 = vmatpush3.bf16.msra.mxu0 %v2555_v47 }
0x2b5b   :  { %v1466_v24 = vpop.permute.xlu1 %1465  ;;  %2519 = vmatprep.subr.bf16.mxu0 %v2849_v0 }
0x2b5c   :  { %1468 = vst.msk [vmem:[#allocation2 + $0x8] sm:$0x40] %vm798_vm10, %v1466_v24 }
0x2b5d   :  { %1045 = vrot.lane.b32.xlu0 %v3268_v44, %s2852_s5  ;;  %v1537_v44 = vsub.f32 1.0, %v3400_v3 }
0x2b61   :  { %1212 = vrot.lane.b32.xlu0 %v3306_v43, %s2852_s5  ;;  %v1543_v43 = vrot.slane %v3377_v34, 7 }
0x2b63   :  { %v1545_v25 = vmul.f32 %v3400_v3, %v1543_v43  ;;  %v2250_v3 = vld [vmem:[#allocation8] ss:$0 sm:$0xff] }
0x2b65   :  { %1380 = vrot.lane.b32.xlu0 %v3347_v48, %s2852_s5 }
0x2bbb   :  { %v1540_v48 = vpop.permute.xlu0 %1539 }
0x2bbc   :  { %v1542_v26 = vmul.f32 %v1540_v48, %v1537_v44 }
0x2bbe   :  { %v1546_v1 = vadd.f32 %v1545_v25, %v1542_v26 }
0x2bbf   :  { %v371_v28 = vpop.permute.xlu0 %370 }
0x2bc0   :  { %374 = vst.msk [vmem:[#allocation2] sm:$0x2] %vm373_vm11, %v371_v28  ;;  %1548 = vrot.lane.b32.xlu0 %v1546_v1, %s2852_s5 }
0x2bc3   :  { %v540_v29 = vpop.permute.xlu0 %539 }
0x2bc4   :  { %543 = vst.msk [vmem:[#allocation2] sm:$0x8] %vm542_vm12, %v540_v29 }
0x2bc7   :  { %v710_v30 = vpop.permute.xlu0 %709 }
0x2bc8   :  { %713 = vst.msk [vmem:[#allocation2] sm:$0x20] %vm712_vm13, %v710_v30 }
0x2bcb   :  { %v880_v31 = vpop.permute.xlu0 %879 }
0x2bcc   :  { %883 = vst.msk [vmem:[#allocation2] sm:$0x80] %vm882_vm14, %v880_v31 }
0x2bcf   :  { %v1046_v32 = vpop.permute.xlu0 %1045 }
0x2bd0   :  { %1048 = vst.msk [vmem:[#allocation2 + $0x8] sm:$0x2] %vm373_vm11, %v1046_v32 }
0x2bd3   :  { %v1213_v33 = vpop.permute.xlu0 %1212  ;;  %v3487_v46 = vld [vmem:[#allocation2] sm:$0xff] }
0x2bd4   :  { %1215 = vst.msk [vmem:[#allocation2 + $0x8] sm:$0x8] %vm542_vm12, %v1213_v33 }
0x2bd7   :  { %v1381_v34 = vpop.permute.xlu0 %1380 }
0x2bd8   :  { %1383 = vst.msk [vmem:[#allocation2 + $0x8] sm:$0x20] %vm712_vm13, %v1381_v34 }
0x2c0e   :  { %v1762_v37 = vpop.f32.mrb[40].mxu0 }
0x2c0f   :  { %v3477_v38 = vadd.f32 %v2239_v35, %v1762_v37  ;;  %v2493_v10 = vpop.f32.mrb[41].mxu0 }
0x2c10   :  { %v1765_v39 = vpop.f32.mrb[42].mxu0 }
0x2c11   :  { %v3479_v40 = vadd.f32 %v2239_v35, %v1765_v39  ;;  %v2494_v41 = vpop.f32.mrb[43].mxu0 }
0x2c13   :  { %v1772_v42 = vpack.c.bf16 %v3479_v40, %v3477_v38 }
0x2c15   :  { %2500 = vmatmul.mubr.msk.bf16.vlgmr.msra.gmra.mrb[40].mxu1 %vm216_vm3, %v1772_v42 }
0x2c16   :  { %2515 = vmatprep.mubr.msk.bf16.mxu1 %vm2850_vm0, %v2849_v0  ;;  %2512 = vmatpush3.bf16.msra.mxu1 %v2556_v22 }
0x2c17   :  { %2513 = vmatprep.subr.bf16.mxu1 %v2849_v0 }
0x2c1a   :  { %2514 = vmatpush3.bf16.msra.mxu1 %v2558_v18 }
0x2c1b   :  { %2527 = vmatprep.subr.bf16.mxu1 %v2849_v0 }
0x2c32   :  { %v1549_v45 = vpop.permute.xlu0 %1548 }
0x2c33   :  { %1551 = vst.msk [vmem:[#allocation2 + $0x8] sm:$0x80] %vm882_vm14, %v1549_v45 }
0x2c3a   :  { %v3489_v50 = vld [vmem:[#allocation2 + $0x8] sm:$0xff] }
0x2c3b   :  { %v1771_v51 = vpack.c.bf16 %v3489_v50, %v3487_v46 }
0x2c3d   :  { %2508 = vmatmul.mubr.msk.bf16.vlgmr.msra.gmra.mrb[44].mxu0 %vm216_vm3, %v1771_v51 }
0x2c3e   :  { %2523 = vmatprep.mubr.msk.bf16.mxu0 %vm2850_vm0, %v2849_v0  ;;  %2520 = vmatpush3.bf16.msra.mxu0 %v2557_v9 }
0x2c3f   :  { %2521 = vmatprep.subr.bf16.mxu0 %v2849_v0 }
0x2c42   :  { %2522 = vmatpush3.bf16.msra.mxu0 %v2559_v11 }
0x2ce8   :  { %v1830_v21 = vpop.f32.mrb[40].mxu1 }
0x2ce9   :  { %v2501_v52 = vpop.f32.mrb[41].mxu1 }
0x2cea   :  { %v1833_v54 = vpop.f32.mrb[42].mxu1 }
0x2ceb   :  { %v2502_v56 = vpop.f32.mrb[43].mxu1 }
0x2d10   :  { %v1886_v57 = vpop.f32.mrb[44].mxu0 }
0x2d11   :  { %v1887_v59 = vadd.f32 %v1886_v57, %v1830_v21  ;;  %v2509_v61 = vpop.f32.mrb[45].mxu0 }
0x2d12   :  { %v1889_v62 = vpop.f32.mrb[46].mxu0 }
0x2d13   :  { %v1900_v55 = vadd.f32 %v2249_v58, %v1887_v59  ;;  %v1890_v63 = vadd.f32 %v1889_v62, %v1833_v54  ;;  %v2510_v4 = vpop.f32.mrb[47].mxu0 }
0x2d15   :  { %2658 = vtanh.f32 %v1900_v55  ;;  %v1901_v2 = vadd.f32 %v2249_v58, %v1890_v63 }
0x2d17   :  { %2660 = vtanh.f32 %v1901_v2 }
0x2d1f   :  { %v2659_v5 = vpop.eup %2658 }
0x2d20   :  { %v1911_v6 = vmul.f32 %v2659_v5, %v2250_v3 }
0x2d21   :  { %v2661_v7 = vpop.eup %2660 }
0x2d22   :  { %v1914_v8 = vsel %vm1913_vm15, %v1911_v6, 0.0  ;;  %v1912_v36 = vmul.f32 %v2661_v7, %v2250_v3 }
0x2d23   :  { %1915 = vadd.xlane.f32.xlu1 %v1914_v8  ;;  %v2085_v8 = vld [vmem:[#allocation11] sm:$0x1] }
0x2d24   :  { %v1917_v27 = vsel %vm1913_vm15, %v1912_v36, 0.0 }
0x2d25   :  { %1918 = vadd.xlane.f32.xlu0 %v1917_v27 }
0x2d3b   :  { %2100 = vrot.lane.b32.xlu0 %v2099_v17, %s2843_s12 }
0x2db0   :  { %v1916_v15 = vpop.xlane.xlu1 %1915 }
0x2db2   :  { %v1919_v19 = vpop.xlane.xlu0 %1918 }
0x2db3   :  { %v1920_v20 = vmax.f32 %v1916_v15, %v1919_v19 }
0x2db5   :  { %v1921_v23 = vrot.slane %v1920_v20, 4 }
0x2db7   :  { %v1922_v24 = vmax.f32 %v1920_v20, %v1921_v23  ;;  %v2101_v20 = vpop.permute.xlu0 %2100 }
0x2db9   :  { %v1923_v60 = vrot.slane %v1922_v24, 2 }
0x2dbb   :  { %v1924_v53 = vmax.f32 %v1922_v24, %v1923_v60 }
0x2dbd   :  { %v1925_v49 = vrot.slane %v1924_v53, 1 }
0x2dbf   :  { %v1926_v47 = vmax.f32 %v1924_v53, %v1925_v49  ;;  %v2560_v49 = vld [vmem:[%s3566_s18] sm:$0xff]  }
0x2dc1   :  { %v1927_v44 = vsub.f32 %v1916_v15, %v1926_v47  ;;  %v1928_v43 = vsub.f32 %v1919_v19, %v1926_v47 }
0x2dc3   :  { %v1929_v48 = vmul.f32 1.442695, %v1927_v44  ;;  %v1931_v25 = vmul.f32 1.442695, %v1928_v43 }
0x2dc5   :  { %2662 = vpow2.f32 %v1929_v48 }
0x2dc6   :  { %2664 = vpow2.f32 %v1931_v25 }
0x2dcf   :  { %v2663_v26 = vpop.eup %2662 }
0x2dd0   :  { %v2665_v1 = vpop.eup %2664 }
0x2dd1   :  { %v1933_v28 = vadd.f32 %v2665_v1, %v2663_v26 }
0x2dd3   :  { %v1934_v29 = vrot.slane %v1933_v28, 4 }
0x2dd5   :  { %v1935_v30 = vadd.f32 %v1934_v29, %v1933_v28 }
0x2dd7   :  { %v1936_v31 = vrot.slane %v1935_v30, 2 }
0x2dd9   :  { %v1937_v32 = vadd.f32 %v1936_v31, %v1935_v30 }
0x2ddb   :  { %v1938_v33 = vrot.slane %v1937_v32, 1 }
0x2ddd   :  { %v1939_v34 = vadd.f32 %v1938_v33, %v1937_v32 }
0x2ddf   :  { %2666 = vrcp.f32 %v1939_v34 }
0x2de9   :  { %v2667_v35 = vpop.eup %2666 }
0x2dea   :  { %v1941_v37 = vmul.f32 %v2667_v35, %v2663_v26  ;;  %v1942_v10 = vmul.f32 %v2667_v35, %v2665_v1  ;;  %v2121_v1 = vld [vmem:[%s3567_s19] sm:$0x1] }
0x2dec   :  { %v1943_v39 = vmul.f32 %v1941_v37, %v3487_v46  ;;  %v1944_v41 = vmul.f32 %v1942_v10, %v3489_v50  ;;  %v1954_v42 = vmul.f32 %v1941_v37, %v3477_v38  ;;  %v1955_v45 = vmul.f32 %v1942_v10, %v3479_v40 }
0x2dee   :  { %v1946_v51 = vsel %vm216_vm3, %v1944_v41, 0.0  ;;  %v1957_v21 = vsel %vm216_vm3, %v1955_v45, 0.0  ;;  %v1956_v52 = vsel %vm216_vm3, %v1954_v42, 0.0  ;;  %v1945_v54 = vsel %vm216_vm3, %v1943_v39, 0.0 }
0x2def   :  { %v1958_v56 = vadd.f32 %v1957_v21, %v1956_v52  ;;  %v1947_v57 = vadd.f32 %v1946_v51, %v1945_v54 }
0x2df1   :  { %v1959_v58 = vrot.slane %v1958_v56, 4  ;;  %v1948_v59 = vrot.slane %v1947_v57, 4 }
0x2df3   :  { %v1960_v61 = vadd.f32 %v1959_v58, %v1958_v56  ;;  %v1949_v46 = vadd.f32 %v1948_v59, %v1947_v57 }
0x2df5   :  { %v1961_v62 = vrot.slane %v1960_v61, 2  ;;  %v1950_v50 = vrot.slane %v1949_v46, 2 }
0x2df7   :  { %v1962_v55 = vadd.f32 %v1961_v62, %v1960_v61  ;;  %v1951_v38 = vadd.f32 %v1950_v50, %v1949_v46 }
0x2df9   :  { %v1963_v63 = vrot.slane %v1962_v55, 1  ;;  %v1952_v40 = vrot.slane %v1951_v38, 1 }
0x2dfb   :  { %v1964_v4 = vadd.f32 %v1963_v63, %v1962_v55  ;;  %v1953_v2 = vadd.f32 %v1952_v40, %v1951_v38 }
0x2dfd   :  { %v1970_v3 = vpack.c.bf16 %v1964_v4, %v1964_v4  ;;  %v1965_v5 = vpack.c.bf16 %v1953_v2, %v1953_v2 }
0x2dff   :  { %2516 = vmatmul.mubr.msk.bf16.vlgmr.msra.gmra.mrb[44].mxu1 %vm216_vm3, %v1970_v3  ;;  %2524 = vmatmul.mubr.msk.bf16.vlgmr.msra.gmra.mrb[48].mxu0 %vm216_vm3, %v1965_v5 }
0x2e00   :  { %2531 = vmatprep.mubr.msk.bf16.mxu1 %vm2850_vm0, %v2849_v0  ;;  %2528 = vmatpush3.bf16.msra.mxu1 %v2560_v49  ;;  %vm2180_vm0 = vcmask 57344  }
0x2e01   :  { %2529 = vmatprep.subr.bf16.mxu1 %v2849_v0 }
0x2ed2   :  { %v2024_v6 = vpop.f32.mrb[44].mxu1  ;;  %v2079_v7 = vpop.f32.mrb[48].mxu0 }
0x2ed3   :  { %v2080_v36 = vadd.f32 %v2079_v7, %v2024_v6  ;;  %v2517_v27 = vpop.f32.mrb[45].mxu1  ;;  %v2525_v22 = vpop.f32.mrb[49].mxu0 }
0x2ed4   :  { %v2027_v9 = vpop.f32.mrb[46].mxu1  ;;  %v2082_v18 = vpop.f32.mrb[50].mxu0 }
0x2ed5   :  { %v2086_v11 = vadd.f32 %v2085_v8, %v2080_v36  ;;  %v2518_v13 = vpop.f32.mrb[47].mxu1  ;;  %v2526_v14 = vpop.f32.mrb[51].mxu0 }
0x2ed7   :  { %v2088_v16 = vadd.f32 %v3505_v12, %v2086_v11  ;;  %v2561_v12 = vld [vmem:[%s3566_s18 + $0x8] sm:$0xff]   ;;  %s2853_s18 = smov [#allocation14]  }
0x2ed8   :  { %2530 = vmatpush3.bf16.msra.mxu1 %v2561_v12  ;;  %s2188_s6 = sshll.u32 %s2853_s18, 4  ;;  %s2189_s6 = int_to_ptr.vmem [resolvable:$true] %s2188_s6 }
0x2ed9   :  { %v2257_v17 = vmul.f32 -1.442695, %v2088_v16  ;;  %s2809_s7 = scalar_lea.vmem %s2189_s6, 16  ;;  %p2814_p7 = scmp.lt.s32.totalorder %s2189_s6, %s2189_s6 }
0x2eda   :  { %p2810_p6 = scmp.ne.s32.totalorder %s2189_s6, %s2809_s7 }
0x2edb   :  { %2668 = vpow2.f32 %v2257_v17 }
0x2ee5   :  { %v2669_v15 = vpop.eup %2668 }
0x2ee6   :  { %v2092_v19 = vadd.f32 1.0, %v2669_v15 }
0x2ee8   :  { %2670 = vrcp.f32 %v2092_v19 }
0x2ef2   :  { %v2671_v23 = vpop.eup %2670 }
0x2ef3   :  { %v2103_v24 = vmul.f32 %v2671_v23, %v2101_v20  ;;  %v2110_v44 = vsub.f32 1.0, %v2671_v23 }
0x2ef5   :  { %2105 = vrot.lane.b32.xlu1 %v2103_v24, %s2843_s12 }
0x2f67   :  { %v2106_v60 = vpop.permute.xlu1 %2105 }
0x2f68   :  { %v2108_v53 = vadd.f32 %v2106_v60, %v2086_v11 }
0x2f6a   :  { %2672 = vtanh.f32 %v2108_v53 }
0x2f74   :  { %v2673_v47 = vpop.eup %2672 }
0x2f75   :  { %2112 = vrot.lane.b32.xlu1 %v2673_v47, %s2852_s5 }
0x2fe7   :  { %v2113_v43 = vpop.permute.xlu1 %2112 }
0x2fe8   :  { %v2115_v48 = vmul.f32 %v2113_v43, %v2110_v44 }
0x2fea   :  { %v2116_v25 = vpack.c.bf16 %v2115_v48, %v2115_v48 }
0x2fec   :  { %2123 = vrot.lane.b32.xlu0 %v2116_v25, %s2852_s5  ;;  %s2813_s5 = scalar_lea.vmem %s2189_s6, 32 }
0x2fed   :  { %p2815_p8 = scmp.lt.s32.totalorder %s2813_s5, %s2809_s7 }
0x2fef   :  { %p2816_p9 = por %p2815_p8, %p2814_p7 }
0x2ff1   :  { %p2817_p10 = pnand %p2816_p9, %p2810_p6 }
0x305e   :  { %v2124_v26 = vpop.permute.xlu0 %2123 }
0x305f   :  { %2532 = vmatmul.mubr.msk.bf16.vlgmr.msra.gmra.mrb[48].mxu1 %vm216_vm3, %v2124_v26 }
0x3132   :  { %v2174_v0 = vpop.f32.mrb[48].mxu1 }
0x3133   :  { %v2175_v28 = vadd.f32 %v2174_v0, %v2121_v1  ;;  %v2533_v29 = vpop.f32.mrb[49].mxu1 }
0x3134   :  { %v2177_v30 = vpop.f32.mrb[50].mxu1 }
0x3135   :  { %v2534_v31 = vpop.f32.mrb[51].mxu1  ;;  %2181 = vst.msk [vmem:[#allocation14] sm:$0x1] %vm2180_vm0, %v2175_v28 }
0x3136   :  { %2820 = shalt.err (!%p2817_p10)
}
0x3137   :  { %s2821_s28 = scalar_lea.hbm %s3568_s20, 16 }
0x3138   :  { %p2822_p11 = scmp.ne.s32.totalorder %s3568_s20, %s2821_s28  ;;  %p2825_p12 = scmp.lt.u32.totalorder %s2821_s28, %s3568_s20 }
0x313a   :  { %p2827_p13 = pnand %p2825_p12, %p2822_p11 }
0x313c   :  { %2830 = shalt.err (!%p2827_p13)
}
0x313d   :  { %2191 = dma.vmem_to_hbm [thread:$0]  %s2189_s6, 16, %s3568_s20, [#allocation5]  }
0x313e   :  { %2839 = dma.done.wait [#allocation5], 16  }
0x313f   :  { %2840 = vsyncadd [#allocation5], 4294967280 }
0x3140   :  { %2195 = vsyncpa [#allocation4], 1 }
0x3141   :  { %2196 = vsyncpa [#allocation7], 1 }
0x3142   :  { %2197 = vsyncpa [#allocation10], 1 }
0x3143   :  { %2198 = vsyncpa [#allocation13], 1 }
0x3144   :  { %2199 = vsyncpa [#allocation5], 1 }

</bundles_post_ra>
